<compile_context>
chip_gen: v5e
topology: v5e:2x2
jax: 0.10.0
libtpu: 0.0.40
codegen_flags: <defaults>
</compile_context>

<pallas_src>
import math
from functools import partial

import jax
import jax.numpy as jnp
from jax.experimental import pallas as pl
from jax.experimental.pallas import tpu as pltpu


# ----------------------------------------------------------------------------
# Fused encoder kernel: all layers + masked mean pool, per batch block.
# ----------------------------------------------------------------------------
def _fused_encoder_kernel(
    x_ref, padb_ref, amask_ref, invlen_ref,
    wqkv_ref, bqkv_ref, wo_ref, bo_ref,
    w1_ref, b1_ref, w2_ref, b2_ref,
    ln1w_ref, ln1b_ref, ln2w_ref, ln2b_ref,
    pooled_ref, attn_ref,
    *, nlayer, nhead, eps=1e-5,
):
    Bt, L, D = x_ref.shape
    hd = D // nhead
    scale = 1.0 / math.sqrt(hd)

    x = x_ref[...].reshape(Bt * L, D)                  # f32, resident across layers
    pad_row = padb_ref[...].reshape(Bt, L)             # 0 (valid) / -1e9 (pad)
    amask = amask_ref[...]                              # (L, L) additive mask

    # TODO(synk): for realistic L (maxlen 1601) KV-tile the score/softmax
    # (flash-style online softmax, attn written per key tile) so the (L, L)
    # working set fits v7x's 64 MiB VMEM; at small/medium L the full-row
    # softmax below is cheaper and simpler.
    # TODO(synk): for nlayer >> 2 switch to lax.fori_loop with dynamic
    # wqkv_ref[l] indexing (or a grid axis over layers) so only one layer's
    # weights need be resident.
    for l in range(nlayer):                             # static unroll (nlayer small)
        is_last = l == nlayer - 1

        # --- fused QKV projection: one (Bt*L, D) @ (D, 3D) bf16 MXU matmul ---
        qkv = jnp.dot(x.astype(jnp.bfloat16), wqkv_ref[l],
                      preferred_element_type=jnp.float32) + bqkv_ref[l]

        # Scale Q once (all heads), cast activations to bf16 at the dot boundary.
        q_all = (qkv[:, :D] * scale).astype(jnp.bfloat16).reshape(Bt, L, D)
        k_all = qkv[:, D:2 * D].astype(jnp.bfloat16).reshape(Bt, L, D)
        v_all = qkv[:, 2 * D:].astype(jnp.bfloat16).reshape(Bt, L, D)

        ctx_heads = []
        attn_sum = jnp.zeros((Bt, L, L), jnp.float32) if is_last else None
        # TODO(synk): hd-wide lane slices under-fill vregs for small head dims;
        # a head-batched (Bt*nhead, L, hd) layout would remove the per-head
        # lane extracts at the cost of a 4-D relayout per layer.
        for h in range(nhead):                           # static unroll over heads
            sl = slice(h * hd, (h + 1) * hd)
            q_h = q_all[:, :, sl]
            k_h = k_all[:, :, sl]
            v_h = v_all[:, :, sl]

            # Scores + additive masks via broadcast (no (Bt, L, L) bias tensor).
            s = jnp.einsum('bqd,bkd->bqk', q_h, k_h,
                           preferred_element_type=jnp.float32)
            s = s + amask[None, :, :] + pad_row[:, None, :]
            s = s - jnp.max(s, axis=-1, keepdims=True)
            e = jnp.exp(s)
            p = e * pl.reciprocal(jnp.sum(e, axis=-1, keepdims=True), approx=True)
            if is_last:
                attn_sum = attn_sum + p

            ctx_heads.append(
                jnp.einsum('bqk,bkd->bqd', p.astype(jnp.bfloat16), v_h,
                           preferred_element_type=jnp.float32))

        # Single output projection: concat heads back onto lanes once, then one
        # (Bt*L, D) @ (D, D) bf16 matmul.
        ctx = jnp.concatenate(ctx_heads, axis=-1).reshape(Bt * L, D)
        attn_out = jnp.dot(ctx.astype(jnp.bfloat16), wo_ref[l],
                           preferred_element_type=jnp.float32) + bo_ref[l]

        # --- residual + LayerNorm 1 (f32) ------------------------------------
        h1 = x + attn_out
        mu1 = jnp.mean(h1, axis=-1, keepdims=True)
        var1 = jnp.mean(jnp.square(h1 - mu1), axis=-1, keepdims=True)
        x1 = (h1 - mu1) * jax.lax.rsqrt(var1 + eps) * ln1w_ref[l] + ln1b_ref[l]

        # --- feed-forward (ReLU), bf16 matmuls, f32 accumulation --------------
        ff = jnp.maximum(
            jnp.dot(x1.astype(jnp.bfloat16), w1_ref[l],
                    preferred_element_type=jnp.float32) + b1_ref[l], 0.0)
        ff = jnp.dot(ff.astype(jnp.bfloat16), w2_ref[l],
                     preferred_element_type=jnp.float32) + b2_ref[l]

        # --- residual + LayerNorm 2 (f32) -------------------------------------
        h2 = x1 + ff
        mu2 = jnp.mean(h2, axis=-1, keepdims=True)
        var2 = jnp.mean(jnp.square(h2 - mu2), axis=-1, keepdims=True)
        x = (h2 - mu2) * jax.lax.rsqrt(var2 + eps) * ln2w_ref[l] + ln2b_ref[l]

        if is_last:
            # Head-averaged attention weights (PyTorch default), last layer only,
            # emitted in bf16 to halve the (B, L, L) writeback.
            attn_ref[...] = (attn_sum * (1.0 / nhead)).astype(attn_ref.dtype)

    # --- fused masked mean-pool over the sequence axis -------------------------
    # NOTE: pooled block is (Bt, 1, D) with D lanes -> masked partial stores;
    # negligible here (one row per sequence).
    valid = jnp.where(pad_row < -0.5, 0.0, 1.0)          # (Bt, L)
    inv_len = invlen_ref[...].reshape(Bt, 1)              # (Bt, 1)
    pooled = jnp.sum(valid[:, :, None] * x.reshape(Bt, L, D), axis=1) * inv_len
    pooled_ref[...] = pooled.reshape(Bt, 1, D)


# ----------------------------------------------------------------------------
# Generation-aware VMEM budget + batch-tile heuristic
# ----------------------------------------------------------------------------
def _vmem_limit_bytes():
    """~physical-8MiB capped at 100 MiB: ~100 MiB on v5e/v6e (128 MiB physical),
    ~56 MiB on v7x (64 MiB physical); conservative fallback if the query fails."""
    try:
        cap = int(pltpu.get_tpu_info().vmem_capacity_bytes)
        return int(min(cap - 8 * 1024 * 1024, 100 * 1024 * 1024))
    except Exception:
        return 32 * 1024 * 1024


def _pick_batch_tile(batch, seqlen, d_model, d_ff, nlayer, vmem_budget):
    """Largest divisor Bt of `batch` whose per-block working set fits the VMEM
    budget.  Grid steps are a serial loop on v5e/v6e (1 TensorCore), so no
    '>=2 steps' preference there; on v7x (2 TCs) prefer >=2 parallel steps
    as long as it doesn't shrink the tile by more than 2x."""
    # Rough per-sequence live f32 bytes: activations / qkv / ffn intermediates
    # + per-head (L, L) score/prob + last-layer attn accumulator + bf16 attn out.
    per_seq = (4 * seqlen * (6 * d_model + d_ff)
               + 4 * seqlen * seqlen * 3
               + 2 * seqlen * seqlen)
    # All layers' weights stay resident (bf16 matmul weights, double-buffered).
    weight_bytes = 2 * nlayer * (
        2 * (3 * d_model * d_model + d_model * d_model + 2 * d_model * d_ff)
        + 4 * 10 * d_model)
    budget = max(vmem_budget - weight_bytes, 2 * per_seq) // 2  # io double-buffering
    divs = [d for d in range(1, batch + 1) if batch % d == 0]
    cand = [d for d in divs if d * per_seq <= budget] or [1]
    best = max(cand)
    try:
        kind = jax.devices()[0].device_kind.lower()
    except Exception:
        kind = ""
    if "v7" in kind or kind.startswith("tpu7"):
        multi = [d for d in cand if batch // d >= 2]
        if multi and 2 * max(multi) >= best:
            best = max(multi)
    return best


# ----------------------------------------------------------------------------
# SpatialAttentionEncoder wrapper
# ----------------------------------------------------------------------------
def make_positional_encoding(maxlen, emb_size):
    den = jnp.exp(jnp.arange(0, emb_size, 2, dtype=jnp.float32)
                  * (-math.log(10000.0) / emb_size))
    pos = jnp.arange(0, maxlen, dtype=jnp.float32)[:, None]
    pe = jnp.zeros((maxlen, emb_size), dtype=jnp.float32)
    pe = pe.at[:, 0::2].set(jnp.sin(pos * den))
    pe = pe.at[:, 1::2].set(jnp.cos(pos * den))
    return pe                                            # (maxlen, D)


def init_params(key, nlayer, d_model, d_ff):
    """Per-layer weights stacked along a leading layer axis (f32 masters)."""
    def w(k, shape):
        return 0.05 * jax.random.normal(k, shape, jnp.float32)
    ks = jax.random.split(key, 4)
    return dict(
        wqkv=w(ks[0], (nlayer, d_model, 3 * d_model)),
        bqkv=jnp.zeros((nlayer, 1, 3 * d_model), jnp.float32),
        wo=w(ks[1], (nlayer, d_model, d_model)),
        bo=jnp.zeros((nlayer, 1, d_model), jnp.float32),
        w1=w(ks[2], (nlayer, d_model, d_ff)),
        b1=jnp.zeros((nlayer, 1, d_ff), jnp.float32),
        w2=w(ks[3], (nlayer, d_ff, d_model)),
        b2=jnp.zeros((nlayer, 1, d_model), jnp.float32),
        ln1w=jnp.ones((nlayer, 1, d_model), jnp.float32),
        ln1b=jnp.zeros((nlayer, 1, d_model), jnp.float32),
        ln2w=jnp.ones((nlayer, 1, d_model), jnp.float32),
        ln2b=jnp.zeros((nlayer, 1, d_model), jnp.float32),
    )


_WEIGHT_NAMES = ('wqkv', 'bqkv', 'wo', 'bo', 'w1', 'b1', 'w2', 'b2',
                 'ln1w', 'ln1b', 'ln2w', 'ln2b')
_MATMUL_WEIGHTS = ('wqkv', 'wo', 'w1', 'w2')


def spatial_attention_encoder(src, attn_mask, src_padding_mask, src_len,
                              params, pos_embedding, *, nhead, nlayer):
    """
    src: (L, B, D) float32   (PyTorch seq-first convention)
    attn_mask: (L, L) float32 additive mask
    src_padding_mask: (B, L) bool, True = pad
    src_len: (B,) float/int
    returns (rtn: (B, D) f32, attn: (B, L, L) bf16)
    """
    L, B, D = src.shape
    # Positional encoding (dropout identity in eval mode), to batch-first.
    x = jnp.transpose(src + pos_embedding[:L][:, None, :], (1, 0, 2))
    x = x.astype(jnp.float32)                                    # (B, L, D)

    # Additive padding bias row (0 / -1e9); bias is applied by broadcast inside
    # the kernel (no (B, L, L) tensor is materialized or DMA'd).
    pad_bias = jnp.where(src_padding_mask, jnp.float32(-1e9),
                         jnp.float32(0.0)).reshape(B, 1, L)
    amask = attn_mask.astype(jnp.float32)

    # NOTE: intentional divergence from the PyTorch reference: zero-length
    # sequences pool to 0 instead of inf/NaN.
    src_len_f = src_len.astype(jnp.float32)
    inv_len = jnp.where(src_len_f > 0, 1.0 / jnp.maximum(src_len_f, 1.0),
                        0.0).reshape(B, 1, 1)

    d_ff = params['w1'].shape[-1]
    vmem_limit = _vmem_limit_bytes()
    Bt = _pick_batch_tile(B, L, D, d_ff, nlayer, vmem_limit)
    grid = (B // Bt,)

    # bf16 MXU weights (halves weight VMEM / DMA); biases + LN params stay f32.
    weights = []
    for n in _WEIGHT_NAMES:
        w = params[n]
        if n in _MATMUL_WEIGHTS:
            w = w.astype(jnp.bfloat16)
        weights.append(w)

    def batched(shape):
        nd = len(shape)
        return pl.BlockSpec(shape, lambda b, nd=nd: (b,) + (0,) * (nd - 1))

    def full(a):
        nd = a.ndim
        return pl.BlockSpec(a.shape, lambda b, nd=nd: (0,) * nd)

    # NOTE: weight / amask specs are grid-invariant; pl.Buffered(1) would halve
    # their VMEM footprint but pipeline_mode support varies by jax release, so
    # the default buffering is kept.
    in_specs = [
        batched((Bt, L, D)),       # x
        batched((Bt, 1, L)),       # pad_bias row
        full(amask),               # attn_mask
        batched((Bt, 1, 1)),       # inv_len
    ] + [full(w) for w in weights]
    out_specs = (
        batched((Bt, 1, D)),       # pooled (f32)
        batched((Bt, L, L)),       # attn (bf16, last layer only)
    )

    kernel = partial(_fused_encoder_kernel, nlayer=nlayer, nhead=nhead)
    pooled, attn = pl.pallas_call(
        kernel,
        out_shape=(jax.ShapeDtypeStruct((B, 1, D), jnp.float32),
                   jax.ShapeDtypeStruct((B, L, L), jnp.bfloat16)),
        grid=grid,
        in_specs=in_specs,
        out_specs=out_specs,
        compiler_params=pltpu.CompilerParams(
            dimension_semantics=("parallel",),
            vmem_limit_bytes=vmem_limit,
        ),
    )(x, pad_bias, amask, inv_len, *weights)
    return pooled.reshape(B, D), attn


# ----------------------------------------------------------------------------
# Pure-JAX f32 reference (for correctness check)
# ----------------------------------------------------------------------------
def _reference_forward(src, attn_mask, src_padding_mask, src_len,
                       params, pos_embedding, *, nhead, nlayer):
    L, B, D = src.shape
    hd = D // nhead
    hp = jax.lax.Precision.HIGHEST
    x = jnp.transpose(src + pos_embedding[:L][:, None, :], (1, 0, 2)).astype(jnp.float32)
    bias = (attn_mask[None] +
            jnp.where(src_padding_mask, -1e9, 0.0)[:, None, :]).astype(jnp.float32)

    def ln(v, w, b, eps=1e-5):
        mu = jnp.mean(v, axis=-1, keepdims=True)
        var = jnp.mean(jnp.square(v - mu), axis=-1, keepdims=True)
        return (v - mu) * jax.lax.rsqrt(var + eps) * w + b

    attn = None
    for l in range(nlayer):
        qkv = jnp.einsum('bld,de->ble', x, params['wqkv'][l],
                         precision=hp) + params['bqkv'][l]
        q = qkv[..., :D].reshape(B, L, nhead, hd)
        k = qkv[..., D:2 * D].reshape(B, L, nhead, hd)
        v = qkv[..., 2 * D:].reshape(B, L, nhead, hd)
        s = jnp.einsum('bqhd,bkhd->bhqk', q * (1.0 / math.sqrt(hd)), k,
                       precision=hp) + bias[:, None]
        p = jax.nn.softmax(s, axis=-1)
        attn = p.mean(axis=1)
        ctx = jnp.einsum('bhqk,bkhd->bqhd', p, v, precision=hp).reshape(B, L, D)
        a_out = jnp.einsum('bld,de->ble', ctx, params['wo'][l],
                           precision=hp) + params['bo'][l]
        x1 = ln(x + a_out, params['ln1w'][l], params['ln1b'][l])
        ff = jax.nn.relu(jnp.einsum('bld,df->blf', x1, params['w1'][l],
                                    precision=hp) + params['b1'][l])
        ff = jnp.einsum('blf,fd->bld', ff, params['w2'][l],
                        precision=hp) + params['b2'][l]
        x = ln(x1 + ff, params['ln2w'][l], params['ln2b'][l])

    valid = (~src_padding_mask).astype(jnp.float32)
    pooled = jnp.sum(valid[:, :, None] * x, axis=1) / src_len.astype(jnp.float32)[:, None]
    return pooled, attn


# ----------------------------------------------------------------------------
if __name__ == "__main__":
    NINPUT = 32     # d_model
    NHIDDEN = 64    # dim_feedforward
    NHEAD = 4
    NLAYER = 2
    B = 2
    L = 8

    key = jax.random.PRNGKey(0)
    k_src, k_params = jax.random.split(key)

    src = jax.random.normal(k_src, (L, B, NINPUT), jnp.float32)      # seq-first
    lengths = jnp.array([8, 5], dtype=jnp.int32)
    src_padding_mask = jnp.arange(L)[None, :] >= lengths[:, None]    # (B, L) bool
    src_len = lengths.astype(jnp.float32)                            # (B,)
    attn_mask = jnp.zeros((L, L), jnp.float32)                       # no structural mask

    params = init_params(k_params, NLAYER, NINPUT, NHIDDEN)
    pos_embedding = make_positional_encoding(1601, NINPUT)

    rtn, attn = spatial_attention_encoder(
        src, attn_mask, src_padding_mask, src_len, params, pos_embedding,
        nhead=NHEAD, nlayer=NLAYER)
    rtn = jax.block_until_ready(rtn)
    attn = jax.block_until_ready(attn)

    assert rtn.shape == (B, NINPUT)
    assert attn.shape == (B, L, L)
    attn_f32 = attn.astype(jnp.float32)
    assert bool(jnp.all(jnp.isfinite(rtn))) and bool(jnp.all(jnp.isfinite(attn_f32)))

    # Validate against a pure-JAX f32 reference (bf16 matmuls in the kernel ->
    # looser tolerance than the previous all-f32 version).
    rtn_ref, attn_ref = _reference_forward(
        src, attn_mask, src_padding_mask, src_len, params, pos_embedding,
        nhead=NHEAD, nlayer=NLAYER)
    assert float(jnp.max(jnp.abs(rtn - rtn_ref))) < 2e-2
    assert float(jnp.max(jnp.abs(attn_f32 - attn_ref))) < 2e-2

    print("KERNEL_OK")
</pallas_src>

<mosaic_0001>
module attributes {stable_mosaic.version = 11 : i64} {
  func.func @_fused_encoder_kernel(%arg0: i32, %arg1: memref<2x8x32xf32, #tpu.memory_space<vmem>>, %arg2: memref<2x1x8xf32, #tpu.memory_space<vmem>>, %arg3: memref<8x8xf32, #tpu.memory_space<vmem>>, %arg4: memref<2x1x1xf32, #tpu.memory_space<vmem>>, %arg5: memref<2x32x96xbf16, #tpu.memory_space<vmem>>, %arg6: memref<2x1x96xf32, #tpu.memory_space<vmem>>, %arg7: memref<2x32x32xbf16, #tpu.memory_space<vmem>>, %arg8: memref<2x1x32xf32, #tpu.memory_space<vmem>>, %arg9: memref<2x32x64xbf16, #tpu.memory_space<vmem>>, %arg10: memref<2x1x64xf32, #tpu.memory_space<vmem>>, %arg11: memref<2x64x32xbf16, #tpu.memory_space<vmem>>, %arg12: memref<2x1x32xf32, #tpu.memory_space<vmem>>, %arg13: memref<2x1x32xf32, #tpu.memory_space<vmem>>, %arg14: memref<2x1x32xf32, #tpu.memory_space<vmem>>, %arg15: memref<2x1x32xf32, #tpu.memory_space<vmem>>, %arg16: memref<2x1x32xf32, #tpu.memory_space<vmem>>, %arg17: memref<2x1x32xf32, #tpu.memory_space<vmem>>, %arg18: memref<2x8x8xbf16, #tpu.memory_space<vmem>>) attributes {dimension_semantics = [#tpu.dimension_semantics<parallel>], iteration_bounds = array<i64: 1>, scalar_prefetch = 0 : i64, scratch_operands = 0 : i64, tpu.core_type = #tpu.core_type<tc>, window_params = [{transform_indices = @transform_0, window_bounds = array<i64: 2, 8, 32>}, {transform_indices = @transform_1, window_bounds = array<i64: 2, 1, 8>}, {pipeline_mode = #tpu.pipeline_mode<synchronous>, transform_indices = @transform_2, window_bounds = array<i64: 8, 8>}, {transform_indices = @transform_3, window_bounds = array<i64: 2, 1, 1>}, {pipeline_mode = #tpu.pipeline_mode<synchronous>, transform_indices = @transform_4, window_bounds = array<i64: 2, 32, 96>}, {pipeline_mode = #tpu.pipeline_mode<synchronous>, transform_indices = @transform_5, window_bounds = array<i64: 2, 1, 96>}, {pipeline_mode = #tpu.pipeline_mode<synchronous>, transform_indices = @transform_6, window_bounds = array<i64: 2, 32, 32>}, {pipeline_mode = #tpu.pipeline_mode<synchronous>, transform_indices = @transform_7, window_bounds = array<i64: 2, 1, 32>}, {pipeline_mode = #tpu.pipeline_mode<synchronous>, transform_indices = @transform_8, window_bounds = array<i64: 2, 32, 64>}, {pipeline_mode = #tpu.pipeline_mode<synchronous>, transform_indices = @transform_9, window_bounds = array<i64: 2, 1, 64>}, {pipeline_mode = #tpu.pipeline_mode<synchronous>, transform_indices = @transform_10, window_bounds = array<i64: 2, 64, 32>}, {pipeline_mode = #tpu.pipeline_mode<synchronous>, transform_indices = @transform_11, window_bounds = array<i64: 2, 1, 32>}, {pipeline_mode = #tpu.pipeline_mode<synchronous>, transform_indices = @transform_12, window_bounds = array<i64: 2, 1, 32>}, {pipeline_mode = #tpu.pipeline_mode<synchronous>, transform_indices = @transform_13, window_bounds = array<i64: 2, 1, 32>}, {pipeline_mode = #tpu.pipeline_mode<synchronous>, transform_indices = @transform_14, window_bounds = array<i64: 2, 1, 32>}, {pipeline_mode = #tpu.pipeline_mode<synchronous>, transform_indices = @transform_15, window_bounds = array<i64: 2, 1, 32>}, {transform_indices = @transform_16, window_bounds = array<i64: 2, 1, 32>}, {transform_indices = @transform_17, window_bounds = array<i64: 2, 8, 8>}]} {
    %c0 = arith.constant 0 : index
    %c0_0 = arith.constant 0 : index
    %c0_1 = arith.constant 0 : index
    %0 = vector.load %arg1[%c0, %c0_0, %c0_1] : memref<2x8x32xf32, #tpu.memory_space<vmem>>, vector<2x8x32xf32>
    %1 = vector.shape_cast %0 : vector<2x8x32xf32> to vector<16x32xf32>
    %c0_2 = arith.constant 0 : index
    %c0_3 = arith.constant 0 : index
    %c0_4 = arith.constant 0 : index
    %2 = vector.load %arg2[%c0_2, %c0_3, %c0_4] : memref<2x1x8xf32, #tpu.memory_space<vmem>>, vector<2x1x8xf32>
    %3 = vector.shape_cast %2 : vector<2x1x8xf32> to vector<2x8xf32>
    %c0_5 = arith.constant 0 : index
    %c0_6 = arith.constant 0 : index
    %4 = vector.load %arg3[%c0_5, %c0_6] : memref<8x8xf32, #tpu.memory_space<vmem>>, vector<8x8xf32>
    %5 = arith.truncf %1 : vector<16x32xf32> to vector<16x32xbf16>
    %c0_7 = arith.constant 0 : index
    %c0_8 = arith.constant 0 : index
    %c0_9 = arith.constant 0 : index
    %6 = vector.load %arg5[%c0_7, %c0_8, %c0_9] : memref<2x32x96xbf16, #tpu.memory_space<vmem>>, vector<1x32x96xbf16>
    %7 = vector.shape_cast %6 : vector<1x32x96xbf16> to vector<32x96xbf16>
    %cst = arith.constant dense<0.000000e+00> : vector<16x96xf32>
    %8 = tpu.matmul %5, %7, %cst {dimension_numbers = #tpu.dot_dimension_numbers<[1], [0], [0], [1], [0, 0, 1, 1], [], []>} : vector<16x32xbf16>, vector<32x96xbf16>, vector<16x96xf32> -> vector<16x96xf32>
    %c0_10 = arith.constant 0 : index
    %c0_11 = arith.constant 0 : index
    %c0_12 = arith.constant 0 : index
    %9 = vector.load %arg6[%c0_10, %c0_11, %c0_12] : memref<2x1x96xf32, #tpu.memory_space<vmem>>, vector<1x1x96xf32>
    %10 = vector.shape_cast %9 : vector<1x1x96xf32> to vector<1x96xf32>
    %11 = vector.broadcast %10 : vector<1x96xf32> to vector<16x96xf32>
    %12 = arith.addf %8, %11 : vector<16x96xf32>
    %13 = vector.extract_strided_slice %12 {offsets = [0, 0], sizes = [16, 32], strides = [1, 1]} : vector<16x96xf32> to vector<16x32xf32>
    %cst_13 = arith.constant 0.353553385 : f32
    %14 = vector.broadcast %cst_13 : f32 to vector<16x32xf32>
    %15 = arith.mulf %13, %14 : vector<16x32xf32>
    %16 = arith.truncf %15 : vector<16x32xf32> to vector<16x32xbf16>
    %17 = vector.shape_cast %16 : vector<16x32xbf16> to vector<2x8x32xbf16>
    %18 = vector.extract_strided_slice %12 {offsets = [0, 32], sizes = [16, 32], strides = [1, 1]} : vector<16x96xf32> to vector<16x32xf32>
    %19 = arith.truncf %18 : vector<16x32xf32> to vector<16x32xbf16>
    %20 = vector.shape_cast %19 : vector<16x32xbf16> to vector<2x8x32xbf16>
    %21 = vector.extract_strided_slice %12 {offsets = [0, 64], sizes = [16, 32], strides = [1, 1]} : vector<16x96xf32> to vector<16x32xf32>
    %22 = arith.truncf %21 : vector<16x32xf32> to vector<16x32xbf16>
    %23 = vector.shape_cast %22 : vector<16x32xbf16> to vector<2x8x32xbf16>
    %24 = vector.extract_strided_slice %17 {offsets = [0, 0, 0], sizes = [2, 8, 8], strides = [1, 1, 1]} : vector<2x8x32xbf16> to vector<2x8x8xbf16>
    %25 = vector.extract_strided_slice %20 {offsets = [0, 0, 0], sizes = [2, 8, 8], strides = [1, 1, 1]} : vector<2x8x32xbf16> to vector<2x8x8xbf16>
    %26 = vector.extract_strided_slice %23 {offsets = [0, 0, 0], sizes = [2, 8, 8], strides = [1, 1, 1]} : vector<2x8x32xbf16> to vector<2x8x8xbf16>
    "tpu.trace_start"() <{level = 10 : i32, message = "bqd,bkd->bqk"}> : () -> ()
    %cst_14 = arith.constant dense<0.000000e+00> : vector<2x8x8xf32>
    %27 = tpu.matmul %24, %25, %cst_14 {dimension_numbers = #tpu.dot_dimension_numbers<[2], [2], [1], [1], [0, 0, 0, 1, 1, 1], [0], [0]>} : vector<2x8x8xbf16>, vector<2x8x8xbf16>, vector<2x8x8xf32> -> vector<2x8x8xf32>
    "tpu.trace_stop"() : () -> ()
    %28 = vector.shape_cast %4 : vector<8x8xf32> to vector<1x8x8xf32>
    %29 = vector.broadcast %28 : vector<1x8x8xf32> to vector<2x8x8xf32>
    %30 = arith.addf %27, %29 : vector<2x8x8xf32>
    %31 = vector.shape_cast %3 : vector<2x8xf32> to vector<2x1x8xf32>
    %32 = vector.broadcast %31 : vector<2x1x8xf32> to vector<2x8x8xf32>
    %33 = arith.addf %30, %32 : vector<2x8x8xf32>
    %cst_15 = arith.constant dense<0xFF800000> : vector<2x8xf32>
    %34 = vector.multi_reduction <maximumf>, %33, %cst_15 [2] : vector<2x8x8xf32> to vector<2x8xf32>
    %35 = vector.shape_cast %34 : vector<2x8xf32> to vector<2x8x1xf32>
    %36 = vector.broadcast %35 : vector<2x8x1xf32> to vector<2x8x8xf32>
    %37 = arith.subf %33, %36 : vector<2x8x8xf32>
    %38 = math.exp %37 : vector<2x8x8xf32>
    %cst_16 = arith.constant dense<0.000000e+00> : vector<2x8xf32>
    %39 = vector.multi_reduction <add>, %38, %cst_16 [2] : vector<2x8x8xf32> to vector<2x8xf32>
    %40 = vector.shape_cast %39 : vector<2x8xf32> to vector<2x8x1xf32>
    %41 = tpu.reciprocal %40 {approx = true} : vector<2x8x1xf32> -> vector<2x8x1xf32>
    %42 = vector.broadcast %41 : vector<2x8x1xf32> to vector<2x8x8xf32>
    %43 = arith.mulf %38, %42 : vector<2x8x8xf32>
    %44 = arith.truncf %43 : vector<2x8x8xf32> to vector<2x8x8xbf16>
    "tpu.trace_start"() <{level = 10 : i32, message = "bqk,bkd->bqd"}> : () -> ()
    %cst_17 = arith.constant dense<0.000000e+00> : vector<2x8x8xf32>
    %45 = tpu.matmul %44, %26, %cst_17 {dimension_numbers = #tpu.dot_dimension_numbers<[2], [1], [1], [2], [0, 0, 0, 1, 1, 2], [0], [0]>} : vector<2x8x8xbf16>, vector<2x8x8xbf16>, vector<2x8x8xf32> -> vector<2x8x8xf32>
    "tpu.trace_stop"() : () -> ()
    %46 = vector.extract_strided_slice %17 {offsets = [0, 0, 8], sizes = [2, 8, 8], strides = [1, 1, 1]} : vector<2x8x32xbf16> to vector<2x8x8xbf16>
    %47 = vector.extract_strided_slice %20 {offsets = [0, 0, 8], sizes = [2, 8, 8], strides = [1, 1, 1]} : vector<2x8x32xbf16> to vector<2x8x8xbf16>
    %48 = vector.extract_strided_slice %23 {offsets = [0, 0, 8], sizes = [2, 8, 8], strides = [1, 1, 1]} : vector<2x8x32xbf16> to vector<2x8x8xbf16>
    "tpu.trace_start"() <{level = 10 : i32, message = "bqd,bkd->bqk"}> : () -> ()
    %cst_18 = arith.constant dense<0.000000e+00> : vector<2x8x8xf32>
    %49 = tpu.matmul %46, %47, %cst_18 {dimension_numbers = #tpu.dot_dimension_numbers<[2], [2], [1], [1], [0, 0, 0, 1, 1, 1], [0], [0]>} : vector<2x8x8xbf16>, vector<2x8x8xbf16>, vector<2x8x8xf32> -> vector<2x8x8xf32>
    "tpu.trace_stop"() : () -> ()
    %50 = vector.shape_cast %4 : vector<8x8xf32> to vector<1x8x8xf32>
    %51 = vector.broadcast %50 : vector<1x8x8xf32> to vector<2x8x8xf32>
    %52 = arith.addf %49, %51 : vector<2x8x8xf32>
    %53 = vector.shape_cast %3 : vector<2x8xf32> to vector<2x1x8xf32>
    %54 = vector.broadcast %53 : vector<2x1x8xf32> to vector<2x8x8xf32>
    %55 = arith.addf %52, %54 : vector<2x8x8xf32>
    %cst_19 = arith.constant dense<0xFF800000> : vector<2x8xf32>
    %56 = vector.multi_reduction <maximumf>, %55, %cst_19 [2] : vector<2x8x8xf32> to vector<2x8xf32>
    %57 = vector.shape_cast %56 : vector<2x8xf32> to vector<2x8x1xf32>
    %58 = vector.broadcast %57 : vector<2x8x1xf32> to vector<2x8x8xf32>
    %59 = arith.subf %55, %58 : vector<2x8x8xf32>
    %60 = math.exp %59 : vector<2x8x8xf32>
    %cst_20 = arith.constant dense<0.000000e+00> : vector<2x8xf32>
    %61 = vector.multi_reduction <add>, %60, %cst_20 [2] : vector<2x8x8xf32> to vector<2x8xf32>
    %62 = vector.shape_cast %61 : vector<2x8xf32> to vector<2x8x1xf32>
    %63 = tpu.reciprocal %62 {approx = true} : vector<2x8x1xf32> -> vector<2x8x1xf32>
    %64 = vector.broadcast %63 : vector<2x8x1xf32> to vector<2x8x8xf32>
    %65 = arith.mulf %60, %64 : vector<2x8x8xf32>
    %66 = arith.truncf %65 : vector<2x8x8xf32> to vector<2x8x8xbf16>
    "tpu.trace_start"() <{level = 10 : i32, message = "bqk,bkd->bqd"}> : () -> ()
    %cst_21 = arith.constant dense<0.000000e+00> : vector<2x8x8xf32>
    %67 = tpu.matmul %66, %48, %cst_21 {dimension_numbers = #tpu.dot_dimension_numbers<[2], [1], [1], [2], [0, 0, 0, 1, 1, 2], [0], [0]>} : vector<2x8x8xbf16>, vector<2x8x8xbf16>, vector<2x8x8xf32> -> vector<2x8x8xf32>
    "tpu.trace_stop"() : () -> ()
    %68 = vector.extract_strided_slice %17 {offsets = [0, 0, 16], sizes = [2, 8, 8], strides = [1, 1, 1]} : vector<2x8x32xbf16> to vector<2x8x8xbf16>
    %69 = vector.extract_strided_slice %20 {offsets = [0, 0, 16], sizes = [2, 8, 8], strides = [1, 1, 1]} : vector<2x8x32xbf16> to vector<2x8x8xbf16>
    %70 = vector.extract_strided_slice %23 {offsets = [0, 0, 16], sizes = [2, 8, 8], strides = [1, 1, 1]} : vector<2x8x32xbf16> to vector<2x8x8xbf16>
    "tpu.trace_start"() <{level = 10 : i32, message = "bqd,bkd->bqk"}> : () -> ()
    %cst_22 = arith.constant dense<0.000000e+00> : vector<2x8x8xf32>
    %71 = tpu.matmul %68, %69, %cst_22 {dimension_numbers = #tpu.dot_dimension_numbers<[2], [2], [1], [1], [0, 0, 0, 1, 1, 1], [0], [0]>} : vector<2x8x8xbf16>, vector<2x8x8xbf16>, vector<2x8x8xf32> -> vector<2x8x8xf32>
    "tpu.trace_stop"() : () -> ()
    %72 = vector.shape_cast %4 : vector<8x8xf32> to vector<1x8x8xf32>
    %73 = vector.broadcast %72 : vector<1x8x8xf32> to vector<2x8x8xf32>
    %74 = arith.addf %71, %73 : vector<2x8x8xf32>
    %75 = vector.shape_cast %3 : vector<2x8xf32> to vector<2x1x8xf32>
    %76 = vector.broadcast %75 : vector<2x1x8xf32> to vector<2x8x8xf32>
    %77 = arith.addf %74, %76 : vector<2x8x8xf32>
    %cst_23 = arith.constant dense<0xFF800000> : vector<2x8xf32>
    %78 = vector.multi_reduction <maximumf>, %77, %cst_23 [2] : vector<2x8x8xf32> to vector<2x8xf32>
    %79 = vector.shape_cast %78 : vector<2x8xf32> to vector<2x8x1xf32>
    %80 = vector.broadcast %79 : vector<2x8x1xf32> to vector<2x8x8xf32>
    %81 = arith.subf %77, %80 : vector<2x8x8xf32>
    %82 = math.exp %81 : vector<2x8x8xf32>
    %cst_24 = arith.constant dense<0.000000e+00> : vector<2x8xf32>
    %83 = vector.multi_reduction <add>, %82, %cst_24 [2] : vector<2x8x8xf32> to vector<2x8xf32>
    %84 = vector.shape_cast %83 : vector<2x8xf32> to vector<2x8x1xf32>
    %85 = tpu.reciprocal %84 {approx = true} : vector<2x8x1xf32> -> vector<2x8x1xf32>
    %86 = vector.broadcast %85 : vector<2x8x1xf32> to vector<2x8x8xf32>
    %87 = arith.mulf %82, %86 : vector<2x8x8xf32>
    %88 = arith.truncf %87 : vector<2x8x8xf32> to vector<2x8x8xbf16>
    "tpu.trace_start"() <{level = 10 : i32, message = "bqk,bkd->bqd"}> : () -> ()
    %cst_25 = arith.constant dense<0.000000e+00> : vector<2x8x8xf32>
    %89 = tpu.matmul %88, %70, %cst_25 {dimension_numbers = #tpu.dot_dimension_numbers<[2], [1], [1], [2], [0, 0, 0, 1, 1, 2], [0], [0]>} : vector<2x8x8xbf16>, vector<2x8x8xbf16>, vector<2x8x8xf32> -> vector<2x8x8xf32>
    "tpu.trace_stop"() : () -> ()
    %90 = vector.extract_strided_slice %17 {offsets = [0, 0, 24], sizes = [2, 8, 8], strides = [1, 1, 1]} : vector<2x8x32xbf16> to vector<2x8x8xbf16>
    %91 = vector.extract_strided_slice %20 {offsets = [0, 0, 24], sizes = [2, 8, 8], strides = [1, 1, 1]} : vector<2x8x32xbf16> to vector<2x8x8xbf16>
    %92 = vector.extract_strided_slice %23 {offsets = [0, 0, 24], sizes = [2, 8, 8], strides = [1, 1, 1]} : vector<2x8x32xbf16> to vector<2x8x8xbf16>
    "tpu.trace_start"() <{level = 10 : i32, message = "bqd,bkd->bqk"}> : () -> ()
    %cst_26 = arith.constant dense<0.000000e+00> : vector<2x8x8xf32>
    %93 = tpu.matmul %90, %91, %cst_26 {dimension_numbers = #tpu.dot_dimension_numbers<[2], [2], [1], [1], [0, 0, 0, 1, 1, 1], [0], [0]>} : vector<2x8x8xbf16>, vector<2x8x8xbf16>, vector<2x8x8xf32> -> vector<2x8x8xf32>
    "tpu.trace_stop"() : () -> ()
    %94 = vector.shape_cast %4 : vector<8x8xf32> to vector<1x8x8xf32>
    %95 = vector.broadcast %94 : vector<1x8x8xf32> to vector<2x8x8xf32>
    %96 = arith.addf %93, %95 : vector<2x8x8xf32>
    %97 = vector.shape_cast %3 : vector<2x8xf32> to vector<2x1x8xf32>
    %98 = vector.broadcast %97 : vector<2x1x8xf32> to vector<2x8x8xf32>
    %99 = arith.addf %96, %98 : vector<2x8x8xf32>
    %cst_27 = arith.constant dense<0xFF800000> : vector<2x8xf32>
    %100 = vector.multi_reduction <maximumf>, %99, %cst_27 [2] : vector<2x8x8xf32> to vector<2x8xf32>
    %101 = vector.shape_cast %100 : vector<2x8xf32> to vector<2x8x1xf32>
    %102 = vector.broadcast %101 : vector<2x8x1xf32> to vector<2x8x8xf32>
    %103 = arith.subf %99, %102 : vector<2x8x8xf32>
    %104 = math.exp %103 : vector<2x8x8xf32>
    %cst_28 = arith.constant dense<0.000000e+00> : vector<2x8xf32>
    %105 = vector.multi_reduction <add>, %104, %cst_28 [2] : vector<2x8x8xf32> to vector<2x8xf32>
    %106 = vector.shape_cast %105 : vector<2x8xf32> to vector<2x8x1xf32>
    %107 = tpu.reciprocal %106 {approx = true} : vector<2x8x1xf32> -> vector<2x8x1xf32>
    %108 = vector.broadcast %107 : vector<2x8x1xf32> to vector<2x8x8xf32>
    %109 = arith.mulf %104, %108 : vector<2x8x8xf32>
    %110 = arith.truncf %109 : vector<2x8x8xf32> to vector<2x8x8xbf16>
    "tpu.trace_start"() <{level = 10 : i32, message = "bqk,bkd->bqd"}> : () -> ()
    %cst_29 = arith.constant dense<0.000000e+00> : vector<2x8x8xf32>
    %111 = tpu.matmul %110, %92, %cst_29 {dimension_numbers = #tpu.dot_dimension_numbers<[2], [1], [1], [2], [0, 0, 0, 1, 1, 2], [0], [0]>} : vector<2x8x8xbf16>, vector<2x8x8xbf16>, vector<2x8x8xf32> -> vector<2x8x8xf32>
    "tpu.trace_stop"() : () -> ()
    %112 = tpu.concatenate %45, %67, %89, %111 in 2 : vector<2x8x8xf32>, vector<2x8x8xf32>, vector<2x8x8xf32>, vector<2x8x8xf32> -> vector<2x8x32xf32>
    %113 = vector.shape_cast %112 : vector<2x8x32xf32> to vector<16x32xf32>
    %114 = arith.truncf %113 : vector<16x32xf32> to vector<16x32xbf16>
    %c0_30 = arith.constant 0 : index
    %c0_31 = arith.constant 0 : index
    %c0_32 = arith.constant 0 : index
    %115 = vector.load %arg7[%c0_30, %c0_31, %c0_32] : memref<2x32x32xbf16, #tpu.memory_space<vmem>>, vector<1x32x32xbf16>
    %116 = vector.shape_cast %115 : vector<1x32x32xbf16> to vector<32x32xbf16>
    %cst_33 = arith.constant dense<0.000000e+00> : vector<16x32xf32>
    %117 = tpu.matmul %114, %116, %cst_33 {dimension_numbers = #tpu.dot_dimension_numbers<[1], [0], [0], [1], [0, 0, 1, 1], [], []>} : vector<16x32xbf16>, vector<32x32xbf16>, vector<16x32xf32> -> vector<16x32xf32>
    %c0_34 = arith.constant 0 : index
    %c0_35 = arith.constant 0 : index
    %c0_36 = arith.constant 0 : index
    %118 = vector.load %arg8[%c0_34, %c0_35, %c0_36] : memref<2x1x32xf32, #tpu.memory_space<vmem>>, vector<1x1x32xf32>
    %119 = vector.shape_cast %118 : vector<1x1x32xf32> to vector<1x32xf32>
    %120 = vector.broadcast %119 : vector<1x32xf32> to vector<16x32xf32>
    %121 = arith.addf %117, %120 : vector<16x32xf32>
    %122 = arith.addf %1, %121 : vector<16x32xf32>
    %cst_37 = arith.constant dense<0.000000e+00> : vector<16xf32>
    %123 = vector.multi_reduction <add>, %122, %cst_37 [1] : vector<16x32xf32> to vector<16xf32>
    %124 = vector.shape_cast %123 : vector<16xf32> to vector<16x1xf32>
    %cst_38 = arith.constant 3.200000e+01 : f32
    %125 = vector.broadcast %cst_38 : f32 to vector<16x1xf32>
    %126 = arith.divf %124, %125 : vector<16x1xf32>
    %127 = vector.broadcast %126 : vector<16x1xf32> to vector<16x32xf32>
    %128 = arith.subf %122, %127 : vector<16x32xf32>
    %129 = arith.mulf %128, %128 : vector<16x32xf32>
    %cst_39 = arith.constant dense<0.000000e+00> : vector<16xf32>
    %130 = vector.multi_reduction <add>, %129, %cst_39 [1] : vector<16x32xf32> to vector<16xf32>
    %131 = vector.shape_cast %130 : vector<16xf32> to vector<16x1xf32>
    %cst_40 = arith.constant 3.200000e+01 : f32
    %132 = vector.broadcast %cst_40 : f32 to vector<16x1xf32>
    %133 = arith.divf %131, %132 : vector<16x1xf32>
    %134 = vector.broadcast %126 : vector<16x1xf32> to vector<16x32xf32>
    %135 = arith.subf %122, %134 : vector<16x32xf32>
    %cst_41 = arith.constant 9.99999974E-6 : f32
    %136 = vector.broadcast %cst_41 : f32 to vector<16x1xf32>
    %137 = arith.addf %133, %136 : vector<16x1xf32>
    %138 = math.rsqrt %137 : vector<16x1xf32>
    %139 = vector.broadcast %138 : vector<16x1xf32> to vector<16x32xf32>
    %140 = arith.mulf %135, %139 : vector<16x32xf32>
    %c0_42 = arith.constant 0 : index
    %c0_43 = arith.constant 0 : index
    %c0_44 = arith.constant 0 : index
    %141 = vector.load %arg13[%c0_42, %c0_43, %c0_44] : memref<2x1x32xf32, #tpu.memory_space<vmem>>, vector<1x1x32xf32>
    %142 = vector.shape_cast %141 : vector<1x1x32xf32> to vector<1x32xf32>
    %143 = vector.broadcast %142 : vector<1x32xf32> to vector<16x32xf32>
    %144 = arith.mulf %140, %143 : vector<16x32xf32>
    %c0_45 = arith.constant 0 : index
    %c0_46 = arith.constant 0 : index
    %c0_47 = arith.constant 0 : index
    %145 = vector.load %arg14[%c0_45, %c0_46, %c0_47] : memref<2x1x32xf32, #tpu.memory_space<vmem>>, vector<1x1x32xf32>
    %146 = vector.shape_cast %145 : vector<1x1x32xf32> to vector<1x32xf32>
    %147 = vector.broadcast %146 : vector<1x32xf32> to vector<16x32xf32>
    %148 = arith.addf %144, %147 : vector<16x32xf32>
    %149 = arith.truncf %148 : vector<16x32xf32> to vector<16x32xbf16>
    %c0_48 = arith.constant 0 : index
    %c0_49 = arith.constant 0 : index
    %c0_50 = arith.constant 0 : index
    %150 = vector.load %arg9[%c0_48, %c0_49, %c0_50] : memref<2x32x64xbf16, #tpu.memory_space<vmem>>, vector<1x32x64xbf16>
    %151 = vector.shape_cast %150 : vector<1x32x64xbf16> to vector<32x64xbf16>
    %cst_51 = arith.constant dense<0.000000e+00> : vector<16x64xf32>
    %152 = tpu.matmul %149, %151, %cst_51 {dimension_numbers = #tpu.dot_dimension_numbers<[1], [0], [0], [1], [0, 0, 1, 1], [], []>} : vector<16x32xbf16>, vector<32x64xbf16>, vector<16x64xf32> -> vector<16x64xf32>
    %c0_52 = arith.constant 0 : index
    %c0_53 = arith.constant 0 : index
    %c0_54 = arith.constant 0 : index
    %153 = vector.load %arg10[%c0_52, %c0_53, %c0_54] : memref<2x1x64xf32, #tpu.memory_space<vmem>>, vector<1x1x64xf32>
    %154 = vector.shape_cast %153 : vector<1x1x64xf32> to vector<1x64xf32>
    %155 = vector.broadcast %154 : vector<1x64xf32> to vector<16x64xf32>
    %156 = arith.addf %152, %155 : vector<16x64xf32>
    %cst_55 = arith.constant 0.000000e+00 : f32
    %157 = vector.broadcast %cst_55 : f32 to vector<16x64xf32>
    %158 = arith.maximumf %156, %157 : vector<16x64xf32>
    %159 = arith.truncf %158 : vector<16x64xf32> to vector<16x64xbf16>
    %c0_56 = arith.constant 0 : index
    %c0_57 = arith.constant 0 : index
    %c0_58 = arith.constant 0 : index
    %160 = vector.load %arg11[%c0_56, %c0_57, %c0_58] : memref<2x64x32xbf16, #tpu.memory_space<vmem>>, vector<1x64x32xbf16>
    %161 = vector.shape_cast %160 : vector<1x64x32xbf16> to vector<64x32xbf16>
    %cst_59 = arith.constant dense<0.000000e+00> : vector<16x32xf32>
    %162 = tpu.matmul %159, %161, %cst_59 {dimension_numbers = #tpu.dot_dimension_numbers<[1], [0], [0], [1], [0, 0, 1, 1], [], []>} : vector<16x64xbf16>, vector<64x32xbf16>, vector<16x32xf32> -> vector<16x32xf32>
    %c0_60 = arith.constant 0 : index
    %c0_61 = arith.constant 0 : index
    %c0_62 = arith.constant 0 : index
    %163 = vector.load %arg12[%c0_60, %c0_61, %c0_62] : memref<2x1x32xf32, #tpu.memory_space<vmem>>, vector<1x1x32xf32>
    %164 = vector.shape_cast %163 : vector<1x1x32xf32> to vector<1x32xf32>
    %165 = vector.broadcast %164 : vector<1x32xf32> to vector<16x32xf32>
    %166 = arith.addf %162, %165 : vector<16x32xf32>
    %167 = arith.addf %148, %166 : vector<16x32xf32>
    %cst_63 = arith.constant dense<0.000000e+00> : vector<16xf32>
    %168 = vector.multi_reduction <add>, %167, %cst_63 [1] : vector<16x32xf32> to vector<16xf32>
    %169 = vector.shape_cast %168 : vector<16xf32> to vector<16x1xf32>
    %cst_64 = arith.constant 3.200000e+01 : f32
    %170 = vector.broadcast %cst_64 : f32 to vector<16x1xf32>
    %171 = arith.divf %169, %170 : vector<16x1xf32>
    %172 = vector.broadcast %171 : vector<16x1xf32> to vector<16x32xf32>
    %173 = arith.subf %167, %172 : vector<16x32xf32>
    %174 = arith.mulf %173, %173 : vector<16x32xf32>
    %cst_65 = arith.constant dense<0.000000e+00> : vector<16xf32>
    %175 = vector.multi_reduction <add>, %174, %cst_65 [1] : vector<16x32xf32> to vector<16xf32>
    %176 = vector.shape_cast %175 : vector<16xf32> to vector<16x1xf32>
    %cst_66 = arith.constant 3.200000e+01 : f32
    %177 = vector.broadcast %cst_66 : f32 to vector<16x1xf32>
    %178 = arith.divf %176, %177 : vector<16x1xf32>
    %179 = vector.broadcast %171 : vector<16x1xf32> to vector<16x32xf32>
    %180 = arith.subf %167, %179 : vector<16x32xf32>
    %cst_67 = arith.constant 9.99999974E-6 : f32
    %181 = vector.broadcast %cst_67 : f32 to vector<16x1xf32>
    %182 = arith.addf %178, %181 : vector<16x1xf32>
    %183 = math.rsqrt %182 : vector<16x1xf32>
    %184 = vector.broadcast %183 : vector<16x1xf32> to vector<16x32xf32>
    %185 = arith.mulf %180, %184 : vector<16x32xf32>
    %c0_68 = arith.constant 0 : index
    %c0_69 = arith.constant 0 : index
    %c0_70 = arith.constant 0 : index
    %186 = vector.load %arg15[%c0_68, %c0_69, %c0_70] : memref<2x1x32xf32, #tpu.memory_space<vmem>>, vector<1x1x32xf32>
    %187 = vector.shape_cast %186 : vector<1x1x32xf32> to vector<1x32xf32>
    %188 = vector.broadcast %187 : vector<1x32xf32> to vector<16x32xf32>
    %189 = arith.mulf %185, %188 : vector<16x32xf32>
    %c0_71 = arith.constant 0 : index
    %c0_72 = arith.constant 0 : index
    %c0_73 = arith.constant 0 : index
    %190 = vector.load %arg16[%c0_71, %c0_72, %c0_73] : memref<2x1x32xf32, #tpu.memory_space<vmem>>, vector<1x1x32xf32>
    %191 = vector.shape_cast %190 : vector<1x1x32xf32> to vector<1x32xf32>
    %192 = vector.broadcast %191 : vector<1x32xf32> to vector<16x32xf32>
    %193 = arith.addf %189, %192 : vector<16x32xf32>
    %194 = arith.truncf %193 : vector<16x32xf32> to vector<16x32xbf16>
    %c1 = arith.constant 1 : index
    %c0_74 = arith.constant 0 : index
    %c0_75 = arith.constant 0 : index
    %195 = vector.load %arg5[%c1, %c0_74, %c0_75] : memref<2x32x96xbf16, #tpu.memory_space<vmem>>, vector<1x32x96xbf16>
    %196 = vector.shape_cast %195 : vector<1x32x96xbf16> to vector<32x96xbf16>
    %cst_76 = arith.constant dense<0.000000e+00> : vector<16x96xf32>
    %197 = tpu.matmul %194, %196, %cst_76 {dimension_numbers = #tpu.dot_dimension_numbers<[1], [0], [0], [1], [0, 0, 1, 1], [], []>} : vector<16x32xbf16>, vector<32x96xbf16>, vector<16x96xf32> -> vector<16x96xf32>
    %c1_77 = arith.constant 1 : index
    %c0_78 = arith.constant 0 : index
    %c0_79 = arith.constant 0 : index
    %198 = vector.load %arg6[%c1_77, %c0_78, %c0_79] : memref<2x1x96xf32, #tpu.memory_space<vmem>>, vector<1x1x96xf32>
    %199 = vector.shape_cast %198 : vector<1x1x96xf32> to vector<1x96xf32>
    %200 = vector.broadcast %199 : vector<1x96xf32> to vector<16x96xf32>
    %201 = arith.addf %197, %200 : vector<16x96xf32>
    %202 = vector.extract_strided_slice %201 {offsets = [0, 0], sizes = [16, 32], strides = [1, 1]} : vector<16x96xf32> to vector<16x32xf32>
    %cst_80 = arith.constant 0.353553385 : f32
    %203 = vector.broadcast %cst_80 : f32 to vector<16x32xf32>
    %204 = arith.mulf %202, %203 : vector<16x32xf32>
    %205 = arith.truncf %204 : vector<16x32xf32> to vector<16x32xbf16>
    %206 = vector.shape_cast %205 : vector<16x32xbf16> to vector<2x8x32xbf16>
    %207 = vector.extract_strided_slice %201 {offsets = [0, 32], sizes = [16, 32], strides = [1, 1]} : vector<16x96xf32> to vector<16x32xf32>
    %208 = arith.truncf %207 : vector<16x32xf32> to vector<16x32xbf16>
    %209 = vector.shape_cast %208 : vector<16x32xbf16> to vector<2x8x32xbf16>
    %210 = vector.extract_strided_slice %201 {offsets = [0, 64], sizes = [16, 32], strides = [1, 1]} : vector<16x96xf32> to vector<16x32xf32>
    %211 = arith.truncf %210 : vector<16x32xf32> to vector<16x32xbf16>
    %212 = vector.shape_cast %211 : vector<16x32xbf16> to vector<2x8x32xbf16>
    %cst_81 = arith.constant 0.000000e+00 : f32
    %213 = vector.broadcast %cst_81 : f32 to vector<2x8x8xf32>
    %214 = vector.extract_strided_slice %206 {offsets = [0, 0, 0], sizes = [2, 8, 8], strides = [1, 1, 1]} : vector<2x8x32xbf16> to vector<2x8x8xbf16>
    %215 = vector.extract_strided_slice %209 {offsets = [0, 0, 0], sizes = [2, 8, 8], strides = [1, 1, 1]} : vector<2x8x32xbf16> to vector<2x8x8xbf16>
    %216 = vector.extract_strided_slice %212 {offsets = [0, 0, 0], sizes = [2, 8, 8], strides = [1, 1, 1]} : vector<2x8x32xbf16> to vector<2x8x8xbf16>
    "tpu.trace_start"() <{level = 10 : i32, message = "bqd,bkd->bqk"}> : () -> ()
    %cst_82 = arith.constant dense<0.000000e+00> : vector<2x8x8xf32>
    %217 = tpu.matmul %214, %215, %cst_82 {dimension_numbers = #tpu.dot_dimension_numbers<[2], [2], [1], [1], [0, 0, 0, 1, 1, 1], [0], [0]>} : vector<2x8x8xbf16>, vector<2x8x8xbf16>, vector<2x8x8xf32> -> vector<2x8x8xf32>
    "tpu.trace_stop"() : () -> ()
    %218 = vector.shape_cast %4 : vector<8x8xf32> to vector<1x8x8xf32>
    %219 = vector.broadcast %218 : vector<1x8x8xf32> to vector<2x8x8xf32>
    %220 = arith.addf %217, %219 : vector<2x8x8xf32>
    %221 = vector.shape_cast %3 : vector<2x8xf32> to vector<2x1x8xf32>
    %222 = vector.broadcast %221 : vector<2x1x8xf32> to vector<2x8x8xf32>
    %223 = arith.addf %220, %222 : vector<2x8x8xf32>
    %cst_83 = arith.constant dense<0xFF800000> : vector<2x8xf32>
    %224 = vector.multi_reduction <maximumf>, %223, %cst_83 [2] : vector<2x8x8xf32> to vector<2x8xf32>
    %225 = vector.shape_cast %224 : vector<2x8xf32> to vector<2x8x1xf32>
    %226 = vector.broadcast %225 : vector<2x8x1xf32> to vector<2x8x8xf32>
    %227 = arith.subf %223, %226 : vector<2x8x8xf32>
    %228 = math.exp %227 : vector<2x8x8xf32>
    %cst_84 = arith.constant dense<0.000000e+00> : vector<2x8xf32>
    %229 = vector.multi_reduction <add>, %228, %cst_84 [2] : vector<2x8x8xf32> to vector<2x8xf32>
    %230 = vector.shape_cast %229 : vector<2x8xf32> to vector<2x8x1xf32>
    %231 = tpu.reciprocal %230 {approx = true} : vector<2x8x1xf32> -> vector<2x8x1xf32>
    %232 = vector.broadcast %231 : vector<2x8x1xf32> to vector<2x8x8xf32>
    %233 = arith.mulf %228, %232 : vector<2x8x8xf32>
    %234 = arith.addf %213, %233 : vector<2x8x8xf32>
    %235 = arith.truncf %233 : vector<2x8x8xf32> to vector<2x8x8xbf16>
    "tpu.trace_start"() <{level = 10 : i32, message = "bqk,bkd->bqd"}> : () -> ()
    %cst_85 = arith.constant dense<0.000000e+00> : vector<2x8x8xf32>
    %236 = tpu.matmul %235, %216, %cst_85 {dimension_numbers = #tpu.dot_dimension_numbers<[2], [1], [1], [2], [0, 0, 0, 1, 1, 2], [0], [0]>} : vector<2x8x8xbf16>, vector<2x8x8xbf16>, vector<2x8x8xf32> -> vector<2x8x8xf32>
    "tpu.trace_stop"() : () -> ()
    %237 = vector.extract_strided_slice %206 {offsets = [0, 0, 8], sizes = [2, 8, 8], strides = [1, 1, 1]} : vector<2x8x32xbf16> to vector<2x8x8xbf16>
    %238 = vector.extract_strided_slice %209 {offsets = [0, 0, 8], sizes = [2, 8, 8], strides = [1, 1, 1]} : vector<2x8x32xbf16> to vector<2x8x8xbf16>
    %239 = vector.extract_strided_slice %212 {offsets = [0, 0, 8], sizes = [2, 8, 8], strides = [1, 1, 1]} : vector<2x8x32xbf16> to vector<2x8x8xbf16>
    "tpu.trace_start"() <{level = 10 : i32, message = "bqd,bkd->bqk"}> : () -> ()
    %cst_86 = arith.constant dense<0.000000e+00> : vector<2x8x8xf32>
    %240 = tpu.matmul %237, %238, %cst_86 {dimension_numbers = #tpu.dot_dimension_numbers<[2], [2], [1], [1], [0, 0, 0, 1, 1, 1], [0], [0]>} : vector<2x8x8xbf16>, vector<2x8x8xbf16>, vector<2x8x8xf32> -> vector<2x8x8xf32>
    "tpu.trace_stop"() : () -> ()
    %241 = vector.shape_cast %4 : vector<8x8xf32> to vector<1x8x8xf32>
    %242 = vector.broadcast %241 : vector<1x8x8xf32> to vector<2x8x8xf32>
    %243 = arith.addf %240, %242 : vector<2x8x8xf32>
    %244 = vector.shape_cast %3 : vector<2x8xf32> to vector<2x1x8xf32>
    %245 = vector.broadcast %244 : vector<2x1x8xf32> to vector<2x8x8xf32>
    %246 = arith.addf %243, %245 : vector<2x8x8xf32>
    %cst_87 = arith.constant dense<0xFF800000> : vector<2x8xf32>
    %247 = vector.multi_reduction <maximumf>, %246, %cst_87 [2] : vector<2x8x8xf32> to vector<2x8xf32>
    %248 = vector.shape_cast %247 : vector<2x8xf32> to vector<2x8x1xf32>
    %249 = vector.broadcast %248 : vector<2x8x1xf32> to vector<2x8x8xf32>
    %250 = arith.subf %246, %249 : vector<2x8x8xf32>
    %251 = math.exp %250 : vector<2x8x8xf32>
    %cst_88 = arith.constant dense<0.000000e+00> : vector<2x8xf32>
    %252 = vector.multi_reduction <add>, %251, %cst_88 [2] : vector<2x8x8xf32> to vector<2x8xf32>
    %253 = vector.shape_cast %252 : vector<2x8xf32> to vector<2x8x1xf32>
    %254 = tpu.reciprocal %253 {approx = true} : vector<2x8x1xf32> -> vector<2x8x1xf32>
    %255 = vector.broadcast %254 : vector<2x8x1xf32> to vector<2x8x8xf32>
    %256 = arith.mulf %251, %255 : vector<2x8x8xf32>
    %257 = arith.addf %234, %256 : vector<2x8x8xf32>
    %258 = arith.truncf %256 : vector<2x8x8xf32> to vector<2x8x8xbf16>
    "tpu.trace_start"() <{level = 10 : i32, message = "bqk,bkd->bqd"}> : () -> ()
    %cst_89 = arith.constant dense<0.000000e+00> : vector<2x8x8xf32>
    %259 = tpu.matmul %258, %239, %cst_89 {dimension_numbers = #tpu.dot_dimension_numbers<[2], [1], [1], [2], [0, 0, 0, 1, 1, 2], [0], [0]>} : vector<2x8x8xbf16>, vector<2x8x8xbf16>, vector<2x8x8xf32> -> vector<2x8x8xf32>
    "tpu.trace_stop"() : () -> ()
    %260 = vector.extract_strided_slice %206 {offsets = [0, 0, 16], sizes = [2, 8, 8], strides = [1, 1, 1]} : vector<2x8x32xbf16> to vector<2x8x8xbf16>
    %261 = vector.extract_strided_slice %209 {offsets = [0, 0, 16], sizes = [2, 8, 8], strides = [1, 1, 1]} : vector<2x8x32xbf16> to vector<2x8x8xbf16>
    %262 = vector.extract_strided_slice %212 {offsets = [0, 0, 16], sizes = [2, 8, 8], strides = [1, 1, 1]} : vector<2x8x32xbf16> to vector<2x8x8xbf16>
    "tpu.trace_start"() <{level = 10 : i32, message = "bqd,bkd->bqk"}> : () -> ()
    %cst_90 = arith.constant dense<0.000000e+00> : vector<2x8x8xf32>
    %263 = tpu.matmul %260, %261, %cst_90 {dimension_numbers = #tpu.dot_dimension_numbers<[2], [2], [1], [1], [0, 0, 0, 1, 1, 1], [0], [0]>} : vector<2x8x8xbf16>, vector<2x8x8xbf16>, vector<2x8x8xf32> -> vector<2x8x8xf32>
    "tpu.trace_stop"() : () -> ()
    %264 = vector.shape_cast %4 : vector<8x8xf32> to vector<1x8x8xf32>
    %265 = vector.broadcast %264 : vector<1x8x8xf32> to vector<2x8x8xf32>
    %266 = arith.addf %263, %265 : vector<2x8x8xf32>
    %267 = vector.shape_cast %3 : vector<2x8xf32> to vector<2x1x8xf32>
    %268 = vector.broadcast %267 : vector<2x1x8xf32> to vector<2x8x8xf32>
    %269 = arith.addf %266, %268 : vector<2x8x8xf32>
    %cst_91 = arith.constant dense<0xFF800000> : vector<2x8xf32>
    %270 = vector.multi_reduction <maximumf>, %269, %cst_91 [2] : vector<2x8x8xf32> to vector<2x8xf32>
    %271 = vector.shape_cast %270 : vector<2x8xf32> to vector<2x8x1xf32>
    %272 = vector.broadcast %271 : vector<2x8x1xf32> to vector<2x8x8xf32>
    %273 = arith.subf %269, %272 : vector<2x8x8xf32>
    %274 = math.exp %273 : vector<2x8x8xf32>
    %cst_92 = arith.constant dense<0.000000e+00> : vector<2x8xf32>
    %275 = vector.multi_reduction <add>, %274, %cst_92 [2] : vector<2x8x8xf32> to vector<2x8xf32>
    %276 = vector.shape_cast %275 : vector<2x8xf32> to vector<2x8x1xf32>
    %277 = tpu.reciprocal %276 {approx = true} : vector<2x8x1xf32> -> vector<2x8x1xf32>
    %278 = vector.broadcast %277 : vector<2x8x1xf32> to vector<2x8x8xf32>
    %279 = arith.mulf %274, %278 : vector<2x8x8xf32>
    %280 = arith.addf %257, %279 : vector<2x8x8xf32>
    %281 = arith.truncf %279 : vector<2x8x8xf32> to vector<2x8x8xbf16>
    "tpu.trace_start"() <{level = 10 : i32, message = "bqk,bkd->bqd"}> : () -> ()
    %cst_93 = arith.constant dense<0.000000e+00> : vector<2x8x8xf32>
    %282 = tpu.matmul %281, %262, %cst_93 {dimension_numbers = #tpu.dot_dimension_numbers<[2], [1], [1], [2], [0, 0, 0, 1, 1, 2], [0], [0]>} : vector<2x8x8xbf16>, vector<2x8x8xbf16>, vector<2x8x8xf32> -> vector<2x8x8xf32>
    "tpu.trace_stop"() : () -> ()
    %283 = vector.extract_strided_slice %206 {offsets = [0, 0, 24], sizes = [2, 8, 8], strides = [1, 1, 1]} : vector<2x8x32xbf16> to vector<2x8x8xbf16>
    %284 = vector.extract_strided_slice %209 {offsets = [0, 0, 24], sizes = [2, 8, 8], strides = [1, 1, 1]} : vector<2x8x32xbf16> to vector<2x8x8xbf16>
    %285 = vector.extract_strided_slice %212 {offsets = [0, 0, 24], sizes = [2, 8, 8], strides = [1, 1, 1]} : vector<2x8x32xbf16> to vector<2x8x8xbf16>
    "tpu.trace_start"() <{level = 10 : i32, message = "bqd,bkd->bqk"}> : () -> ()
    %cst_94 = arith.constant dense<0.000000e+00> : vector<2x8x8xf32>
    %286 = tpu.matmul %283, %284, %cst_94 {dimension_numbers = #tpu.dot_dimension_numbers<[2], [2], [1], [1], [0, 0, 0, 1, 1, 1], [0], [0]>} : vector<2x8x8xbf16>, vector<2x8x8xbf16>, vector<2x8x8xf32> -> vector<2x8x8xf32>
    "tpu.trace_stop"() : () -> ()
    %287 = vector.shape_cast %4 : vector<8x8xf32> to vector<1x8x8xf32>
    %288 = vector.broadcast %287 : vector<1x8x8xf32> to vector<2x8x8xf32>
    %289 = arith.addf %286, %288 : vector<2x8x8xf32>
    %290 = vector.shape_cast %3 : vector<2x8xf32> to vector<2x1x8xf32>
    %291 = vector.broadcast %290 : vector<2x1x8xf32> to vector<2x8x8xf32>
    %292 = arith.addf %289, %291 : vector<2x8x8xf32>
    %cst_95 = arith.constant dense<0xFF800000> : vector<2x8xf32>
    %293 = vector.multi_reduction <maximumf>, %292, %cst_95 [2] : vector<2x8x8xf32> to vector<2x8xf32>
    %294 = vector.shape_cast %293 : vector<2x8xf32> to vector<2x8x1xf32>
    %295 = vector.broadcast %294 : vector<2x8x1xf32> to vector<2x8x8xf32>
    %296 = arith.subf %292, %295 : vector<2x8x8xf32>
    %297 = math.exp %296 : vector<2x8x8xf32>
    %cst_96 = arith.constant dense<0.000000e+00> : vector<2x8xf32>
    %298 = vector.multi_reduction <add>, %297, %cst_96 [2] : vector<2x8x8xf32> to vector<2x8xf32>
    %299 = vector.shape_cast %298 : vector<2x8xf32> to vector<2x8x1xf32>
    %300 = tpu.reciprocal %299 {approx = true} : vector<2x8x1xf32> -> vector<2x8x1xf32>
    %301 = vector.broadcast %300 : vector<2x8x1xf32> to vector<2x8x8xf32>
    %302 = arith.mulf %297, %301 : vector<2x8x8xf32>
    %303 = arith.addf %280, %302 : vector<2x8x8xf32>
    %304 = arith.truncf %302 : vector<2x8x8xf32> to vector<2x8x8xbf16>
    "tpu.trace_start"() <{level = 10 : i32, message = "bqk,bkd->bqd"}> : () -> ()
    %cst_97 = arith.constant dense<0.000000e+00> : vector<2x8x8xf32>
    %305 = tpu.matmul %304, %285, %cst_97 {dimension_numbers = #tpu.dot_dimension_numbers<[2], [1], [1], [2], [0, 0, 0, 1, 1, 2], [0], [0]>} : vector<2x8x8xbf16>, vector<2x8x8xbf16>, vector<2x8x8xf32> -> vector<2x8x8xf32>
    "tpu.trace_stop"() : () -> ()
    %306 = tpu.concatenate %236, %259, %282, %305 in 2 : vector<2x8x8xf32>, vector<2x8x8xf32>, vector<2x8x8xf32>, vector<2x8x8xf32> -> vector<2x8x32xf32>
    %307 = vector.shape_cast %306 : vector<2x8x32xf32> to vector<16x32xf32>
    %308 = arith.truncf %307 : vector<16x32xf32> to vector<16x32xbf16>
    %c1_98 = arith.constant 1 : index
    %c0_99 = arith.constant 0 : index
    %c0_100 = arith.constant 0 : index
    %309 = vector.load %arg7[%c1_98, %c0_99, %c0_100] : memref<2x32x32xbf16, #tpu.memory_space<vmem>>, vector<1x32x32xbf16>
    %310 = vector.shape_cast %309 : vector<1x32x32xbf16> to vector<32x32xbf16>
    %cst_101 = arith.constant dense<0.000000e+00> : vector<16x32xf32>
    %311 = tpu.matmul %308, %310, %cst_101 {dimension_numbers = #tpu.dot_dimension_numbers<[1], [0], [0], [1], [0, 0, 1, 1], [], []>} : vector<16x32xbf16>, vector<32x32xbf16>, vector<16x32xf32> -> vector<16x32xf32>
    %c1_102 = arith.constant 1 : index
    %c0_103 = arith.constant 0 : index
    %c0_104 = arith.constant 0 : index
    %312 = vector.load %arg8[%c1_102, %c0_103, %c0_104] : memref<2x1x32xf32, #tpu.memory_space<vmem>>, vector<1x1x32xf32>
    %313 = vector.shape_cast %312 : vector<1x1x32xf32> to vector<1x32xf32>
    %314 = vector.broadcast %313 : vector<1x32xf32> to vector<16x32xf32>
    %315 = arith.addf %311, %314 : vector<16x32xf32>
    %316 = arith.addf %193, %315 : vector<16x32xf32>
    %cst_105 = arith.constant dense<0.000000e+00> : vector<16xf32>
    %317 = vector.multi_reduction <add>, %316, %cst_105 [1] : vector<16x32xf32> to vector<16xf32>
    %318 = vector.shape_cast %317 : vector<16xf32> to vector<16x1xf32>
    %cst_106 = arith.constant 3.200000e+01 : f32
    %319 = vector.broadcast %cst_106 : f32 to vector<16x1xf32>
    %320 = arith.divf %318, %319 : vector<16x1xf32>
    %321 = vector.broadcast %320 : vector<16x1xf32> to vector<16x32xf32>
    %322 = arith.subf %316, %321 : vector<16x32xf32>
    %323 = arith.mulf %322, %322 : vector<16x32xf32>
    %cst_107 = arith.constant dense<0.000000e+00> : vector<16xf32>
    %324 = vector.multi_reduction <add>, %323, %cst_107 [1] : vector<16x32xf32> to vector<16xf32>
    %325 = vector.shape_cast %324 : vector<16xf32> to vector<16x1xf32>
    %cst_108 = arith.constant 3.200000e+01 : f32
    %326 = vector.broadcast %cst_108 : f32 to vector<16x1xf32>
    %327 = arith.divf %325, %326 : vector<16x1xf32>
    %328 = vector.broadcast %320 : vector<16x1xf32> to vector<16x32xf32>
    %329 = arith.subf %316, %328 : vector<16x32xf32>
    %cst_109 = arith.constant 9.99999974E-6 : f32
    %330 = vector.broadcast %cst_109 : f32 to vector<16x1xf32>
    %331 = arith.addf %327, %330 : vector<16x1xf32>
    %332 = math.rsqrt %331 : vector<16x1xf32>
    %333 = vector.broadcast %332 : vector<16x1xf32> to vector<16x32xf32>
    %334 = arith.mulf %329, %333 : vector<16x32xf32>
    %c1_110 = arith.constant 1 : index
    %c0_111 = arith.constant 0 : index
    %c0_112 = arith.constant 0 : index
    %335 = vector.load %arg13[%c1_110, %c0_111, %c0_112] : memref<2x1x32xf32, #tpu.memory_space<vmem>>, vector<1x1x32xf32>
    %336 = vector.shape_cast %335 : vector<1x1x32xf32> to vector<1x32xf32>
    %337 = vector.broadcast %336 : vector<1x32xf32> to vector<16x32xf32>
    %338 = arith.mulf %334, %337 : vector<16x32xf32>
    %c1_113 = arith.constant 1 : index
    %c0_114 = arith.constant 0 : index
    %c0_115 = arith.constant 0 : index
    %339 = vector.load %arg14[%c1_113, %c0_114, %c0_115] : memref<2x1x32xf32, #tpu.memory_space<vmem>>, vector<1x1x32xf32>
    %340 = vector.shape_cast %339 : vector<1x1x32xf32> to vector<1x32xf32>
    %341 = vector.broadcast %340 : vector<1x32xf32> to vector<16x32xf32>
    %342 = arith.addf %338, %341 : vector<16x32xf32>
    %343 = arith.truncf %342 : vector<16x32xf32> to vector<16x32xbf16>
    %c1_116 = arith.constant 1 : index
    %c0_117 = arith.constant 0 : index
    %c0_118 = arith.constant 0 : index
    %344 = vector.load %arg9[%c1_116, %c0_117, %c0_118] : memref<2x32x64xbf16, #tpu.memory_space<vmem>>, vector<1x32x64xbf16>
    %345 = vector.shape_cast %344 : vector<1x32x64xbf16> to vector<32x64xbf16>
    %cst_119 = arith.constant dense<0.000000e+00> : vector<16x64xf32>
    %346 = tpu.matmul %343, %345, %cst_119 {dimension_numbers = #tpu.dot_dimension_numbers<[1], [0], [0], [1], [0, 0, 1, 1], [], []>} : vector<16x32xbf16>, vector<32x64xbf16>, vector<16x64xf32> -> vector<16x64xf32>
    %c1_120 = arith.constant 1 : index
    %c0_121 = arith.constant 0 : index
    %c0_122 = arith.constant 0 : index
    %347 = vector.load %arg10[%c1_120, %c0_121, %c0_122] : memref<2x1x64xf32, #tpu.memory_space<vmem>>, vector<1x1x64xf32>
    %348 = vector.shape_cast %347 : vector<1x1x64xf32> to vector<1x64xf32>
    %349 = vector.broadcast %348 : vector<1x64xf32> to vector<16x64xf32>
    %350 = arith.addf %346, %349 : vector<16x64xf32>
    %cst_123 = arith.constant 0.000000e+00 : f32
    %351 = vector.broadcast %cst_123 : f32 to vector<16x64xf32>
    %352 = arith.maximumf %350, %351 : vector<16x64xf32>
    %353 = arith.truncf %352 : vector<16x64xf32> to vector<16x64xbf16>
    %c1_124 = arith.constant 1 : index
    %c0_125 = arith.constant 0 : index
    %c0_126 = arith.constant 0 : index
    %354 = vector.load %arg11[%c1_124, %c0_125, %c0_126] : memref<2x64x32xbf16, #tpu.memory_space<vmem>>, vector<1x64x32xbf16>
    %355 = vector.shape_cast %354 : vector<1x64x32xbf16> to vector<64x32xbf16>
    %cst_127 = arith.constant dense<0.000000e+00> : vector<16x32xf32>
    %356 = tpu.matmul %353, %355, %cst_127 {dimension_numbers = #tpu.dot_dimension_numbers<[1], [0], [0], [1], [0, 0, 1, 1], [], []>} : vector<16x64xbf16>, vector<64x32xbf16>, vector<16x32xf32> -> vector<16x32xf32>
    %c1_128 = arith.constant 1 : index
    %c0_129 = arith.constant 0 : index
    %c0_130 = arith.constant 0 : index
    %357 = vector.load %arg12[%c1_128, %c0_129, %c0_130] : memref<2x1x32xf32, #tpu.memory_space<vmem>>, vector<1x1x32xf32>
    %358 = vector.shape_cast %357 : vector<1x1x32xf32> to vector<1x32xf32>
    %359 = vector.broadcast %358 : vector<1x32xf32> to vector<16x32xf32>
    %360 = arith.addf %356, %359 : vector<16x32xf32>
    %361 = arith.addf %342, %360 : vector<16x32xf32>
    %cst_131 = arith.constant dense<0.000000e+00> : vector<16xf32>
    %362 = vector.multi_reduction <add>, %361, %cst_131 [1] : vector<16x32xf32> to vector<16xf32>
    %363 = vector.shape_cast %362 : vector<16xf32> to vector<16x1xf32>
    %cst_132 = arith.constant 3.200000e+01 : f32
    %364 = vector.broadcast %cst_132 : f32 to vector<16x1xf32>
    %365 = arith.divf %363, %364 : vector<16x1xf32>
    %366 = vector.broadcast %365 : vector<16x1xf32> to vector<16x32xf32>
    %367 = arith.subf %361, %366 : vector<16x32xf32>
    %368 = arith.mulf %367, %367 : vector<16x32xf32>
    %cst_133 = arith.constant dense<0.000000e+00> : vector<16xf32>
    %369 = vector.multi_reduction <add>, %368, %cst_133 [1] : vector<16x32xf32> to vector<16xf32>
    %370 = vector.shape_cast %369 : vector<16xf32> to vector<16x1xf32>
    %cst_134 = arith.constant 3.200000e+01 : f32
    %371 = vector.broadcast %cst_134 : f32 to vector<16x1xf32>
    %372 = arith.divf %370, %371 : vector<16x1xf32>
    %373 = vector.broadcast %365 : vector<16x1xf32> to vector<16x32xf32>
    %374 = arith.subf %361, %373 : vector<16x32xf32>
    %cst_135 = arith.constant 9.99999974E-6 : f32
    %375 = vector.broadcast %cst_135 : f32 to vector<16x1xf32>
    %376 = arith.addf %372, %375 : vector<16x1xf32>
    %377 = math.rsqrt %376 : vector<16x1xf32>
    %378 = vector.broadcast %377 : vector<16x1xf32> to vector<16x32xf32>
    %379 = arith.mulf %374, %378 : vector<16x32xf32>
    %c1_136 = arith.constant 1 : index
    %c0_137 = arith.constant 0 : index
    %c0_138 = arith.constant 0 : index
    %380 = vector.load %arg15[%c1_136, %c0_137, %c0_138] : memref<2x1x32xf32, #tpu.memory_space<vmem>>, vector<1x1x32xf32>
    %381 = vector.shape_cast %380 : vector<1x1x32xf32> to vector<1x32xf32>
    %382 = vector.broadcast %381 : vector<1x32xf32> to vector<16x32xf32>
    %383 = arith.mulf %379, %382 : vector<16x32xf32>
    %c1_139 = arith.constant 1 : index
    %c0_140 = arith.constant 0 : index
    %c0_141 = arith.constant 0 : index
    %384 = vector.load %arg16[%c1_139, %c0_140, %c0_141] : memref<2x1x32xf32, #tpu.memory_space<vmem>>, vector<1x1x32xf32>
    %385 = vector.shape_cast %384 : vector<1x1x32xf32> to vector<1x32xf32>
    %386 = vector.broadcast %385 : vector<1x32xf32> to vector<16x32xf32>
    %387 = arith.addf %383, %386 : vector<16x32xf32>
    %cst_142 = arith.constant 2.500000e-01 : f32
    %388 = vector.broadcast %cst_142 : f32 to vector<2x8x8xf32>
    %389 = arith.mulf %303, %388 : vector<2x8x8xf32>
    %390 = arith.truncf %389 : vector<2x8x8xf32> to vector<2x8x8xbf16>
    %c0_143 = arith.constant 0 : index
    %c0_144 = arith.constant 0 : index
    %c0_145 = arith.constant 0 : index
    %391 = vector.load %arg18[%c0_143, %c0_144, %c0_145] : memref<2x8x8xbf16, #tpu.memory_space<vmem>>, vector<2x8x8xbf16>
    tpu.vector_store %arg18[%c0_143, %c0_144, %c0_145], %390 {strides = array<i32>} : memref<2x8x8xbf16, #tpu.memory_space<vmem>>, vector<2x8x8xbf16>,
    %cst_146 = arith.constant -5.000000e-01 : f32
    %392 = vector.broadcast %cst_146 : f32 to vector<2x8xf32>
    %393 = arith.cmpf olt, %3, %392 : vector<2x8xf32>
    %cst_147 = arith.constant 0.000000e+00 : f32
    %cst_148 = arith.constant 1.000000e+00 : f32
    %394 = vector.broadcast %cst_147 : f32 to vector<2x8xf32>
    %395 = vector.broadcast %cst_148 : f32 to vector<2x8xf32>
    %396 = arith.select %393, %394, %395 : vector<2x8xi1>, vector<2x8xf32>
    %c0_149 = arith.constant 0 : index
    %c0_150 = arith.constant 0 : index
    %c0_151 = arith.constant 0 : index
    %397 = vector.load %arg4[%c0_149, %c0_150, %c0_151] : memref<2x1x1xf32, #tpu.memory_space<vmem>>, vector<2x1x1xf32>
    %398 = vector.shape_cast %397 : vector<2x1x1xf32> to vector<2x1xf32>
    %399 = vector.shape_cast %396 : vector<2x8xf32> to vector<2x8x1xf32>
    %400 = vector.shape_cast %387 : vector<16x32xf32> to vector<2x8x32xf32>
    %401 = vector.broadcast %399 : vector<2x8x1xf32> to vector<2x8x32xf32>
    %402 = arith.mulf %401, %400 : vector<2x8x32xf32>
    %cst_152 = arith.constant dense<0.000000e+00> : vector<2x32xf32>
    %403 = vector.multi_reduction <add>, %402, %cst_152 [1] : vector<2x8x32xf32> to vector<2x32xf32>
    %404 = vector.broadcast %398 : vector<2x1xf32> to vector<2x32xf32>
    %405 = arith.mulf %403, %404 : vector<2x32xf32>
    %406 = vector.shape_cast %405 : vector<2x32xf32> to vector<2x1x32xf32>
    %c0_153 = arith.constant 0 : index
    %c0_154 = arith.constant 0 : index
    %c0_155 = arith.constant 0 : index
    %407 = vector.load %arg17[%c0_153, %c0_154, %c0_155] : memref<2x1x32xf32, #tpu.memory_space<vmem>>, vector<2x1x32xf32>
    tpu.vector_store %arg17[%c0_153, %c0_154, %c0_155], %406 {strides = array<i32>} : memref<2x1x32xf32, #tpu.memory_space<vmem>>, vector<2x1x32xf32>,
    return
  }
  func.func @transform_0(%arg0: i32) -> (i32, i32, i32) {
    %c0_i32 = arith.constant 0 : i32
    %c0_i32_0 = arith.constant 0 : i32
    %c0_i32_1 = arith.constant 0 : i32
    return %arg0, %c0_i32, %c0_i32_0 : i32, i32, i32
  }
  func.func @transform_1(%arg0: i32) -> (i32, i32, i32) {
    %c0_i32 = arith.constant 0 : i32
    %c0_i32_0 = arith.constant 0 : i32
    %c0_i32_1 = arith.constant 0 : i32
    return %arg0, %c0_i32, %c0_i32_0 : i32, i32, i32
  }
  func.func @transform_2(%arg0: i32) -> (i32, i32) {
    %c0_i32 = arith.constant 0 : i32
    %c0_i32_0 = arith.constant 0 : i32
    %c0_i32_1 = arith.constant 0 : i32
    return %c0_i32, %c0_i32_0 : i32, i32
  }
  func.func @transform_3(%arg0: i32) -> (i32, i32, i32) {
    %c0_i32 = arith.constant 0 : i32
    %c0_i32_0 = arith.constant 0 : i32
    %c0_i32_1 = arith.constant 0 : i32
    return %arg0, %c0_i32, %c0_i32_0 : i32, i32, i32
  }
  func.func @transform_4(%arg0: i32) -> (i32, i32, i32) {
    %c0_i32 = arith.constant 0 : i32
    %c0_i32_0 = arith.constant 0 : i32
    %c0_i32_1 = arith.constant 0 : i32
    %c0_i32_2 = arith.constant 0 : i32
    return %c0_i32, %c0_i32_0, %c0_i32_1 : i32, i32, i32
  }
  func.func @transform_5(%arg0: i32) -> (i32, i32, i32) {
    %c0_i32 = arith.constant 0 : i32
    %c0_i32_0 = arith.constant 0 : i32
    %c0_i32_1 = arith.constant 0 : i32
    %c0_i32_2 = arith.constant 0 : i32
    return %c0_i32, %c0_i32_0, %c0_i32_1 : i32, i32, i32
  }
  func.func @transform_6(%arg0: i32) -> (i32, i32, i32) {
    %c0_i32 = arith.constant 0 : i32
    %c0_i32_0 = arith.constant 0 : i32
    %c0_i32_1 = arith.constant 0 : i32
    %c0_i32_2 = arith.constant 0 : i32
    return %c0_i32, %c0_i32_0, %c0_i32_1 : i32, i32, i32
  }
  func.func @transform_7(%arg0: i32) -> (i32, i32, i32) {
    %c0_i32 = arith.constant 0 : i32
    %c0_i32_0 = arith.constant 0 : i32
    %c0_i32_1 = arith.constant 0 : i32
    %c0_i32_2 = arith.constant 0 : i32
    return %c0_i32, %c0_i32_0, %c0_i32_1 : i32, i32, i32
  }
  func.func @transform_8(%arg0: i32) -> (i32, i32, i32) {
    %c0_i32 = arith.constant 0 : i32
    %c0_i32_0 = arith.constant 0 : i32
    %c0_i32_1 = arith.constant 0 : i32
    %c0_i32_2 = arith.constant 0 : i32
    return %c0_i32, %c0_i32_0, %c0_i32_1 : i32, i32, i32
  }
  func.func @transform_9(%arg0: i32) -> (i32, i32, i32) {
    %c0_i32 = arith.constant 0 : i32
    %c0_i32_0 = arith.constant 0 : i32
    %c0_i32_1 = arith.constant 0 : i32
    %c0_i32_2 = arith.constant 0 : i32
    return %c0_i32, %c0_i32_0, %c0_i32_1 : i32, i32, i32
  }
  func.func @transform_10(%arg0: i32) -> (i32, i32, i32) {
    %c0_i32 = arith.constant 0 : i32
    %c0_i32_0 = arith.constant 0 : i32
    %c0_i32_1 = arith.constant 0 : i32
    %c0_i32_2 = arith.constant 0 : i32
    return %c0_i32, %c0_i32_0, %c0_i32_1 : i32, i32, i32
  }
  func.func @transform_11(%arg0: i32) -> (i32, i32, i32) {
    %c0_i32 = arith.constant 0 : i32
    %c0_i32_0 = arith.constant 0 : i32
    %c0_i32_1 = arith.constant 0 : i32
    %c0_i32_2 = arith.constant 0 : i32
    return %c0_i32, %c0_i32_0, %c0_i32_1 : i32, i32, i32
  }
  func.func @transform_12(%arg0: i32) -> (i32, i32, i32) {
    %c0_i32 = arith.constant 0 : i32
    %c0_i32_0 = arith.constant 0 : i32
    %c0_i32_1 = arith.constant 0 : i32
    %c0_i32_2 = arith.constant 0 : i32
    return %c0_i32, %c0_i32_0, %c0_i32_1 : i32, i32, i32
  }
  func.func @transform_13(%arg0: i32) -> (i32, i32, i32) {
    %c0_i32 = arith.constant 0 : i32
    %c0_i32_0 = arith.constant 0 : i32
    %c0_i32_1 = arith.constant 0 : i32
    %c0_i32_2 = arith.constant 0 : i32
    return %c0_i32, %c0_i32_0, %c0_i32_1 : i32, i32, i32
  }
  func.func @transform_14(%arg0: i32) -> (i32, i32, i32) {
    %c0_i32 = arith.constant 0 : i32
    %c0_i32_0 = arith.constant 0 : i32
    %c0_i32_1 = arith.constant 0 : i32
    %c0_i32_2 = arith.constant 0 : i32
    return %c0_i32, %c0_i32_0, %c0_i32_1 : i32, i32, i32
  }
  func.func @transform_15(%arg0: i32) -> (i32, i32, i32) {
    %c0_i32 = arith.constant 0 : i32
    %c0_i32_0 = arith.constant 0 : i32
    %c0_i32_1 = arith.constant 0 : i32
    %c0_i32_2 = arith.constant 0 : i32
    return %c0_i32, %c0_i32_0, %c0_i32_1 : i32, i32, i32
  }
  func.func @transform_16(%arg0: i32) -> (i32, i32, i32) {
    %c0_i32 = arith.constant 0 : i32
    %c0_i32_0 = arith.constant 0 : i32
    %c0_i32_1 = arith.constant 0 : i32
    return %arg0, %c0_i32, %c0_i32_0 : i32, i32, i32
  }
  func.func @transform_17(%arg0: i32) -> (i32, i32, i32) {
    %c0_i32 = arith.constant 0 : i32
    %c0_i32_0 = arith.constant 0 : i32
    %c0_i32_1 = arith.constant 0 : i32
    return %arg0, %c0_i32, %c0_i32_0 : i32, i32, i32
  }
}

</mosaic_0001>

<bundles_post_ra>
// kernel: tpu_custom_call.1
= control target key start
LH: loop header
LB: loop body
LE: loop exit
PB: predicated region body
PF: predicated region fallthrough
CT: control target
= control target key end

     0   :  { %s2930_s0 = inlined_call_operand.hbm [shape: f32[2,8,32], index: 0, kind: input, shape index: {}]   ;;  %s2931_s1 = inlined_call_operand.vmem [shape: f32[2,1,8], index: 1, kind: input, shape index: {}]   ;;  %s2932_s2 = inlined_call_operand.hbm [shape: f32[8,8], index: 2, kind: input, shape index: {}]   ;;  %s2933_s3 = inlined_call_operand.vmem [shape: f32[2,1,1], index: 3, kind: input, shape index: {}]   ;;  %s2934_s4 = inlined_call_operand.vmem [shape: bf16[2,32,96], index: 4, kind: input, shape index: {}]   ;;  %s2935_s5 = inlined_call_operand.vmem [shape: f32[2,1,96], index: 5, kind: input, shape index: {}]   ;;  %s2936_s6 = inlined_call_operand.vmem [shape: bf16[2,32,32], index: 6, kind: input, shape index: {}]   ;;  %s2937_s7 = inlined_call_operand.vmem [shape: f32[2,1,32], index: 7, kind: input, shape index: {}]   ;;  %s2938_s8 = inlined_call_operand.vmem [shape: bf16[2,32,64], index: 8, kind: input, shape index: {}]   ;;  %s2939_s9 = inlined_call_operand.vmem [shape: f32[2,1,64], index: 9, kind: input, shape index: {}]   ;;  %s2940_s10 = inlined_call_operand.vmem [shape: bf16[2,64,32], index: 10, kind: input, shape index: {}]   ;;  %s2941_s11 = inlined_call_operand.vmem [shape: f32[2,1,32], index: 11, kind: input, shape index: {}]   ;;  %s2942_s12 = inlined_call_operand.vmem [shape: f32[2,1,32], index: 12, kind: input, shape index: {}]   ;;  %s2943_s13 = inlined_call_operand.hbm [shape: f32[2,1,32], index: 13, kind: input, shape index: {}]   ;;  %s2944_s14 = inlined_call_operand.vmem [shape: f32[2,1,32], index: 14, kind: input, shape index: {}]   ;;  %s2945_s15 = inlined_call_operand.hbm [shape: f32[2,1,32], index: 15, kind: input, shape index: {}]   ;;  %s2946_s16 = inlined_call_operand.hbm [shape: f32[2,1,32], index: 16, kind: output, shape index: {0}]   ;;  %s2947_s17 = inlined_call_operand.hbm [shape: bf16[2,8,8], index: 17, kind: output, shape index: {1}]  }
   0x1   :  { %2960 = sst [smem:[#allocation18_spill]] %s2930_s0 }
   0x2   :  { %2961 = sst [smem:[#allocation19_spill]] %s2931_s1 }
   0x3   :  { %23 = vsyncpa [#allocation3], 0 }
   0x4   :  { %24 = vsyncpa [#allocation6], 0 }
   0x5   :  { %25 = vsyncpa [#allocation9], 0 }
   0x6   :  { %26 = vsyncpa [#allocation4], 0  ;;  %s48_s26 = sshll.u32 %s2932_s2, 4  ;;  %s49_s26 = int_to_ptr.hbm [resolvable:$true] %s48_s26 }
   0x7   :  { %27 = vsyncpa [#allocation12], 0  ;;  %s2319_s27 = smov [#allocation5]   ;;  %s2962_s30 = sld [smem:[#allocation18_spill]] }
   0x8   :  { %s50_s28 = sshll.u32 %s2319_s27, 4  ;;  %s2320_s19 = smov [#allocation2]   ;;  %s51_s28 = int_to_ptr.vmem [resolvable:$true] %s50_s28 }
   0x9   :  { %53 = dma.hbm_to_vmem [thread:$0]  %s49_s26, 128, %s51_s28, [#allocation6]  }
   0xa   :  { %s34_s1 = sshll.u32 %s2320_s19, 4  ;;  %s2321_s20 = smov 128   ;;  %s35_s1 = int_to_ptr.vmem [resolvable:$true] %s34_s1 }
   0xb   :  { %s2950_s21 = smov 8   ;;  %s78_s23 = sshll.u32 %s2943_s13, 4  ;;  %s79_s23 = int_to_ptr.hbm [resolvable:$true] %s78_s23 }
   0xc   :  { %s2323_s24 = smov [#allocation7]   ;;  %s93_s26 = sshll.u32 %s2945_s15, 4  ;;  %s94_s26 = int_to_ptr.hbm [resolvable:$true] %s93_s26 }
   0xd   :  { %s32_s18 = sshll.u32 %s2962_s30, 4  ;;  %s80_s25 = sshll.u32 %s2323_s24, 4  ;;  %s33_s18 = int_to_ptr.hbm [resolvable:$true] %s32_s18  ;;  %s81_s25 = int_to_ptr.vmem [resolvable:$true] %s80_s25 }
   0xe   :  { %40 = dma.hbm_to_vmem [thread:$0]  %s33_s18, 256, %s35_s1, [#allocation3], %s2321_s20, %s2321_s20, %s2950_s21  }
   0xf   :  { %s2952_s28 = smov 16   ;;  %s2949_s0 = smov 1  }
  0x10   :  { %86 = dma.hbm_to_vmem [thread:$0]  %s79_s23, 32, %s81_s25, [#allocation6], %s2952_s28, %s2952_s28, %s2949_s0  }
  0x11   :  { %s2326_s30 = smov [#allocation8]  }
  0x12   :  { %s95_s18 = sshll.u32 %s2326_s30, 4  ;;  %s96_s18 = int_to_ptr.vmem [resolvable:$true] %s95_s18 }
  0x13   :  { %101 = dma.hbm_to_vmem [thread:$0]  %s94_s26, 32, %s96_s18, [#allocation9], %s2952_s28, %s2952_s28, %s2949_s0  }
  0x14   :  { %2309 = dma.done.wait [#allocation3], 256  }
  0x15   :  { %2310 = vsyncadd [#allocation3], 4294967040 }
  0x16   :  { %2311 = dma.done.wait [#allocation6], 160  }
  0x17   :  { %2312 = vsyncadd [#allocation6], 4294967136 }
  0x18   :  { %2313 = dma.done.wait [#allocation9], 32  }
  0x19   :  { %2314 = vsyncadd [#allocation9], 4294967264  ;;  %v1981_v0 = vld [vmem:[%s2934_s4 + $0x8] sm:$0xff]  ;;  %v1980_v1 = vld [vmem:[%s2934_s4] sm:$0xff]  ;;  %vm145_vm0 = vcmask 261120   ;;  %s2327_s2 = smov 88  }
  0x1a   :  { %v2460_v2 = vld [vmem:[#allocation2] sm:$0xff]  ;;  %v2462_v3 = vld [vmem:[#allocation2 + $0x8] sm:$0xff]  ;;  %155 = vmatpush.bf16.msra.mxu0 %v1981_v0  ;;  %s2328_s23 = smov 96   ;;  %s2329_s24 = smov 120   ;;  %vm174_vm1 = vcmask 64512   ;;  %v2512_v46 = vld [vmem:[#allocation5] sm:$0xff] }
  0x1b   :  { %v124_v4 = vpack.c.bf16 %v2462_v3, %v2460_v2  ;;  %v2064_v5 = vld [vmem:[%s2935_s5] ss:$0 sm:$0xff]  ;;  %s2330_s25 = smov 80   ;;  %s2331_s27 = smov 112   ;;  %vm255_vm2 = vcmask 1043456   ;;  %vm667_vm3 = vcmask 130048  }
  0x1c   :  { %s2332_s29 = smov 72   ;;  %s2333_s26 = smov 104   ;;  %vm670_vm4 = vcmask 195584   ;;  %vm853_vm12 = vcmask 523264  }
  0x1d   :  { %s2963_s13 = sld [smem:[#allocation19_spill]]  ;;  %s2334_s1 = smov 64  }
  0x1e   :  { %156 = vmatpush.bf16.msra.mxu0 %v1980_v1  ;;  %s2958_s20 = smov 56   ;;  %s2956_s22 = smov 48  }
  0x1f   :  { %s2954_s30 = smov 40   ;;  %s2951_s18 = smov 24  }
  0x20   :  { %s2343_s15 = smov 4  }
  0x21   :  { %1842 = vmatmul.msk.bf16.vlgmr.msra.gmra.mxu0 %vm145_vm0, %v124_v4 }
  0x23   :  { %v2517_v47 = vld [vmem:[%s2963_s13] ss:$0 sm:$0xff]  ;;  %v2528_v58 = vld [vmem:[%s2963_s13 + $0x1] ss:$0 sm:$0xff] }
  0x9e   :  { %v158_v6 = vpop.f32.mrf.mxu0 }
  0x9f   :  { %v159_v7 = vadd.f32 %v2064_v5, %v158_v6 }
  0xa1   :  { %v163_v8 = vmul.f32 0.35355338, %v159_v7  ;;  %v167_v9 = vpack.c.bf16 %v159_v7, %v159_v7 }
  0xa3   :  { %v165_v10 = vpack.c.bf16 %v163_v8, %v163_v8  ;;  %v170_v11 = vunpack.c.l.b16 %v167_v9 }
  0xa5   :  { %v2470_v12 = vpack.c.b16 %v170_v11, %v170_v11  ;;  %v294_v13 = vunpack.c.l.b16 %v165_v10 }
  0xa6   :  { %v160_v14 = vpop.f32.mrf.mxu0 }
  0xa7   :  { %v161_v15 = vadd.f32 %v2064_v5, %v160_v14  ;;  %298 = vrot.lane.b32.xlu1 %v2470_v12, %s2327_s2  ;;  %172 = vrot.lane.b32.xlu0 %v2470_v12, %s2328_s23  ;;  %v295_v16 = vpack.c.b16 %v294_v13, %v294_v13 }
  0xa9   :  { %v164_v17 = vmul.f32 0.35355338, %v161_v15  ;;  %v168_v18 = vpack.c.bf16 %v161_v15, %v161_v15  ;;  %296 = vrot.lane.b32.xlu2 %v295_v16, %s2329_s24 }
  0xab   :  { %v166_v19 = vpack.c.bf16 %v164_v17, %v164_v17  ;;  %v195_v20 = vunpack.c.l.b16 %v168_v18 }
  0xad   :  { %v2477_v21 = vpack.c.b16 %v195_v20, %v195_v20  ;;  %v320_v22 = vunpack.c.l.b16 %v166_v19 }
  0xaf   :  { %324 = vrot.lane.b32.xlu1 %v2477_v21, %s2327_s2  ;;  %197 = vrot.lane.b32.xlu0 %v2477_v21, %s2328_s23  ;;  %v321_v23 = vpack.c.b16 %v320_v22, %v320_v22 }
  0xb1   :  { %322 = vrot.lane.b32.xlu2 %v321_v23, %s2329_s24 }
  0xb7   :  { %438 = vrot.lane.b32.xlu1 %v2477_v21, %s2330_s25  ;;  %415 = vrot.lane.b32.xlu0 %v2470_v12, %s2330_s25 }
  0xb9   :  { %413 = vrot.lane.b32.xlu2 %v295_v16, %s2331_s27 }
  0xbf   :  { %529 = vrot.lane.b32.xlu1 %v2470_v12, %s2332_s29  ;;  %436 = vrot.lane.b32.xlu0 %v321_v23, %s2331_s27 }
  0xc1   :  { %552 = vrot.lane.b32.xlu2 %v2477_v21, %s2332_s29 }
  0xc7   :  { %550 = vrot.lane.b32.xlu1 %v321_v23, %s2333_s26  ;;  %527 = vrot.lane.b32.xlu0 %v295_v16, %s2333_s26 }
 0x103   :  { %v297_v24 = vpop.permute.xlu2 %296 }
 0x10b   :  { %v323_v29 = vpop.permute.xlu2 %322 }
 0x113   :  { %v414_v34 = vpop.permute.xlu2 %413 }
 0x119   :  { %v299_v25 = vpop.permute.xlu1 %298  ;;  %v173_v26 = vpop.permute.xlu0 %172 }
 0x11a   :  { %v179_v27 = vsel %vm174_vm1, %v173_v26, 0  ;;  %v304_v28 = vsel %vm174_vm1, %v299_v25, 0 }
 0x11b   :  { %188 = vmatpush.bf16.xpose.msra.mxu1 %v179_v27  ;;  %313 = vmatpush.bf16.xpose.msrb.mxu0 %v304_v28  ;;  %v553_v39 = vpop.permute.xlu2 %552 }
 0x11c   :  { %v558_v41 = vsel %vm174_vm1, %v553_v39, 0 }
 0x121   :  { %v325_v30 = vpop.permute.xlu1 %324  ;;  %v198_v31 = vpop.permute.xlu0 %197 }
 0x122   :  { %1843 = vmatmul.msk.bf16.vlgmr.msra.gmra.mxu1 %vm174_vm1, %v165_v10  ;;  %1847 = vmatmul.msk.bf16.vlgmr.msrb.gmra.mxu0 %vm174_vm1, %v297_v24  ;;  %v203_v32 = vsel %vm174_vm1, %v198_v31, 0  ;;  %v330_v33 = vsel %vm174_vm1, %v325_v30, 0 }
 0x123   :  { %212 = vmatpush.bf16.xpose.msra.mxu2 %v203_v32  ;;  %339 = vmatpush.bf16.xpose.msrb.mxu1 %v330_v33 }
 0x129   :  { %v439_v35 = vpop.permute.xlu1 %438  ;;  %v416_v36 = vpop.permute.xlu0 %415 }
 0x12a   :  { %v444_v37 = vsel %vm174_vm1, %v439_v35, 0  ;;  %v421_v38 = vsel %vm174_vm1, %v416_v36, 0  ;;  %1844 = vmatmul.msk.bf16.vlgmr.msra.gmra.mxu2 %vm174_vm1, %v166_v19 }
 0x12b   :  { %430 = vmatpush.bf16.xpose.msra.mxu0 %v421_v38  ;;  %453 = vmatpush.bf16.xpose.msra.mxu1 %v444_v37 }
 0x131   :  { %v530_v40 = vpop.permute.xlu1 %529  ;;  %v437_v43 = vpop.permute.xlu0 %436 }
 0x132   :  { %v535_v42 = vsel %vm174_vm1, %v530_v40, 0  ;;  %1848 = vmatmul.msk.bf16.vlgmr.msrb.gmra.mxu1 %vm174_vm1, %v323_v29  ;;  %1851 = vmatmul.msk.bf16.vlgmr.msra.gmra.mxu0 %vm174_vm1, %v414_v34 }
 0x133   :  { %567 = vmatpush.bf16.xpose.msrb.mxu1 %v558_v41  ;;  %544 = vmatpush.bf16.xpose.msrb.mxu0 %v535_v42 }
 0x139   :  { %v528_v44 = vpop.permute.xlu0 %527  ;;  %v551_v45 = vpop.permute.xlu1 %550 }
 0x142   :  { %1852 = vmatmul.msk.bf16.vlgmr.msra.gmra.mxu1 %vm174_vm1, %v437_v43  ;;  %1855 = vmatmul.msk.bf16.vlgmr.msrb.gmra.mxu0 %vm174_vm1, %v528_v44 }
 0x152   :  { %1856 = vmatmul.msk.bf16.vlgmr.msrb.gmra.mxu1 %vm174_vm1, %v551_v45 }
 0x19f   :  { %v190_v48 = vpop.f32.mrf.mxu1  ;;  %v315_v49 = vpop.f32.mrf.mxu0 }
 0x1a0   :  { %v191_v50 = vadd.f32 %v190_v48, %v2512_v46  ;;  %v316_v51 = vadd.f32 %v315_v49, %v2512_v46 }
 0x1a2   :  { %v345_v52 = vadd.f32 %v2517_v47, %v316_v51  ;;  %v224_v53 = vadd.f32 %v2517_v47, %v191_v50 }
 0x1a4   :  { %v347_v54 = vsel %vm174_vm1, %v345_v52, -inf  ;;  %v226_v55 = vsel %vm174_vm1, %v224_v53, -inf }
 0x1a5   :  { %348 = vmax.xlane.f32.xlu1 %v347_v54  ;;  %227 = vmax.xlane.f32.xlu2 %v226_v55 }
 0x1a7   :  { %v192_v56 = vpop.f32.mrf.mxu1  ;;  %v317_v57 = vpop.f32.mrf.mxu0 }
 0x1ad   :  { %v214_v59 = vpop.f32.mrf.mxu2 }
 0x1ae   :  { %v215_v60 = vadd.f32 %v214_v59, %v2512_v46 }
 0x1af   :  { %v341_v61 = vpop.f32.mrf.mxu1  ;;  %v432_v62 = vpop.f32.mrf.mxu0 }
 0x1b0   :  { %v342_v63 = vadd.f32 %v341_v61, %v2512_v46  ;;  %v225_v0 = vadd.f32 %v2528_v58, %v215_v60  ;;  %v433_v20 = vadd.f32 %v432_v62, %v2512_v46 }
 0x1b2   :  { %v229_v1 = vsel %vm174_vm1, %v225_v0, -inf  ;;  %v346_v4 = vadd.f32 %v2528_v58, %v342_v63  ;;  %v459_v25 = vadd.f32 %v2517_v47, %v433_v20 }
 0x1b3   :  { %230 = vmax.xlane.f32.xlu0 %v229_v1 }
 0x1b4   :  { %v350_v5 = vsel %vm174_vm1, %v346_v4, -inf  ;;  %v461_v27 = vsel %vm174_vm1, %v459_v25, -inf }
 0x1b5   :  { %v216_v6 = vpop.f32.mrf.mxu2  ;;  %351 = vmax.xlane.f32.xlu2 %v350_v5 }
 0x1b7   :  { %v343_v7 = vpop.f32.mrf.mxu1  ;;  %v434_v8 = vpop.f32.mrf.mxu0 }
 0x1be   :  { %272 = vrot.lane.b32.xlu1 %v2477_v21, %s2334_s1 }
 0x1bf   :  { %v455_v9 = vpop.f32.mrf.mxu1  ;;  %v546_v10 = vpop.f32.mrf.mxu0 }
 0x1c0   :  { %v456_v17 = vadd.f32 %v455_v9, %v2512_v46  ;;  %v547_v23 = vadd.f32 %v546_v10, %v2512_v46 }
 0x1c2   :  { %v460_v19 = vadd.f32 %v2528_v58, %v456_v17  ;;  %v573_v26 = vadd.f32 %v2517_v47, %v547_v23 }
 0x1c4   :  { %v464_v24 = vsel %vm174_vm1, %v460_v19, -inf  ;;  %v575_v28 = vsel %vm174_vm1, %v573_v26, -inf }
 0x1c6   :  { %392 = vrot.lane.b32.xlu1 %v2477_v21, %s2958_s20 }
 0x1c7   :  { %371 = vrot.lane.b32.xlu0 %v2470_v12, %s2958_s20  ;;  %v457_v11 = vpop.f32.mrf.mxu1  ;;  %v548_v13 = vpop.f32.mrf.mxu0 }
 0x1cd   :  { %250 = vrot.lane.b32.xlu2 %v2470_v12, %s2334_s1 }
 0x1cf   :  { %v569_v14 = vpop.f32.mrf.mxu1 }
 0x1d0   :  { %v570_v16 = vadd.f32 %v569_v14, %v2512_v46 }
 0x1d2   :  { %v574_v18 = vadd.f32 %v2528_v58, %v570_v16 }
 0x1d4   :  { %v578_v22 = vsel %vm174_vm1, %v574_v18, -inf }
 0x1d7   :  { %v571_v15 = vpop.f32.mrf.mxu1 }
 0x1f0   :  { %579 = vmax.xlane.f32.xlu1 %v578_v22 }
 0x1f1   :  { %465 = vmax.xlane.f32.xlu0 %v464_v24 }
 0x1f6   :  { %462 = vmax.xlane.f32.xlu2 %v461_v27 }
 0x1f9   :  { %576 = vmax.xlane.f32.xlu0 %v575_v28 }
 0x218   :  { %v349_v29 = vpop.xlane.xlu1 %348  ;;  %v228_v30 = vpop.xlane.xlu2 %227 }
 0x219   :  { %v353_v31 = vsub.f32 %v345_v52, %v349_v29  ;;  %v232_v32 = vsub.f32 %v224_v53, %v228_v30 }
 0x21b   :  { %v355_v33 = vmul.f32 1.442695, %v353_v31  ;;  %v234_v34 = vmul.f32 1.442695, %v232_v32 }
 0x21d   :  { %2082 = vpow2.f32 %v355_v33 }
 0x21e   :  { %2084 = vpow2.f32 %v234_v34 }
 0x223   :  { %v2556_v35 = vpop.eup %2082 }
 0x224   :  { %v2558_v36 = vpop.eup %2084  ;;  %v359_v37 = vsel %vm174_vm1, %v2556_v35, 0.0 }
 0x225   :  { %360 = vadd.xlane.f32.xlu0 %v359_v37  ;;  %v238_v38 = vsel %vm174_vm1, %v2558_v36, 0.0 }
 0x226   :  { %239 = vadd.xlane.f32.xlu1 %v238_v38  ;;  %v231_v39 = vpop.xlane.xlu0 %230 }
 0x227   :  { %v233_v40 = vsub.f32 %v225_v0, %v231_v39 }
 0x228   :  { %v352_v41 = vpop.xlane.xlu2 %351 }
 0x229   :  { %v236_v42 = vmul.f32 1.442695, %v233_v40  ;;  %v354_v43 = vsub.f32 %v346_v4, %v352_v41 }
 0x22b   :  { %2086 = vpow2.f32 %v236_v42  ;;  %v357_v44 = vmul.f32 1.442695, %v354_v43 }
 0x22d   :  { %2088 = vpow2.f32 %v357_v44 }
 0x230   :  { %v273_v45 = vpop.permute.xlu1 %272  ;;  %v251_v48 = vpop.permute.xlu2 %250 }
 0x231   :  { %v2564_v49 = vpop.eup %2086  ;;  %v257_v50 = vsel %vm255_vm2, %v251_v48, 0  ;;  %v278_v51 = vsel %vm255_vm2, %v273_v45, 0 }
 0x232   :  { %266 = vmatpush.bf16.msra.mxu3 %v257_v50  ;;  %v241_v52 = vsel %vm174_vm1, %v2564_v49, 0.0 }
 0x233   :  { %v2570_v53 = vpop.eup %2088  ;;  %242 = vadd.xlane.f32.xlu0 %v241_v52 }
 0x234   :  { %v362_v54 = vsel %vm174_vm1, %v2570_v53, 0.0 }
 0x235   :  { %363 = vadd.xlane.f32.xlu2 %v362_v54 }
 0x236   :  { %287 = vmatpush.bf16.msrb.mxu3 %v278_v51 }
 0x238   :  { %v393_v57 = vpop.permute.xlu1 %392 }
 0x239   :  { %v372_v55 = vpop.permute.xlu0 %371  ;;  %v398_v27 = vsel %vm255_vm2, %v393_v57, 0 }
 0x23a   :  { %v377_v56 = vsel %vm255_vm2, %v372_v55, 0 }
 0x23b   :  { %386 = vmatpush.bf16.msrb.mxu2 %v377_v56 }
 0x23f   :  { %506 = vrot.lane.b32.xlu1 %v2477_v21, %s2956_s22 }
 0x24d   :  { %485 = vrot.lane.b32.xlu2 %v2470_v12, %s2956_s22  ;;  %s2342_s22 = smov [#allocation11]  }
 0x263   :  { %v580_v59 = vpop.xlane.xlu1 %579 }
 0x264   :  { %v582_v60 = vsub.f32 %v574_v18, %v580_v59  ;;  %v466_v61 = vpop.xlane.xlu0 %465 }
 0x265   :  { %v468_v62 = vsub.f32 %v460_v19, %v466_v61 }
 0x266   :  { %v585_v0 = vmul.f32 1.442695, %v582_v60 }
 0x267   :  { %v471_v63 = vmul.f32 1.442695, %v468_v62 }
 0x269   :  { %2090 = vpow2.f32 %v471_v63  ;;  %v463_v1 = vpop.xlane.xlu2 %462 }
 0x26a   :  { %v467_v4 = vsub.f32 %v459_v25, %v463_v1  ;;  %2092 = vpow2.f32 %v585_v0 }
 0x26c   :  { %v469_v5 = vmul.f32 1.442695, %v467_v4  ;;  %v577_v6 = vpop.xlane.xlu0 %576 }
 0x26d   :  { %v581_v7 = vsub.f32 %v573_v26, %v577_v6 }
 0x26e   :  { %2094 = vpow2.f32 %v469_v5 }
 0x26f   :  { %v2091_v8 = vpop.eup %2090  ;;  %v583_v9 = vmul.f32 1.442695, %v581_v7 }
 0x270   :  { %v476_v10 = vsel %vm174_vm1, %v2091_v8, 0.0  ;;  %v2580_v11 = vpop.eup %2092 }
 0x271   :  { %2096 = vpow2.f32 %v583_v9  ;;  %477 = vadd.xlane.f32.xlu0 %v476_v10  ;;  %v590_v14 = vsel %vm174_vm1, %v2580_v11, 0.0 }
 0x274   :  { %v2095_v13 = vpop.eup %2094 }
 0x275   :  { %v473_v15 = vsel %vm174_vm1, %v2095_v13, 0.0 }
 0x276   :  { %591 = vadd.xlane.f32.xlu2 %v590_v14  ;;  %474 = vadd.xlane.f32.xlu1 %v473_v15 }
 0x277   :  { %v2097_v16 = vpop.eup %2096 }
 0x278   :  { %v587_v17 = vsel %vm174_vm1, %v2097_v16, 0.0 }
 0x279   :  { %588 = vadd.xlane.f32.xlu0 %v587_v17 }
 0x28d   :  { %599 = vrot.lane.b32.xlu0 %v2470_v12, %s2954_s30 }
 0x28f   :  { %620 = vrot.lane.b32.xlu1 %v2477_v21, %s2954_s30  ;;  %s1812_s30 = sshll.u32 %s2342_s22, 4  ;;  %s1813_s30 = int_to_ptr.vmem [resolvable:$true] %s1812_s30 }
 0x298   :  { %v361_v18 = vpop.xlane.xlu0 %360 }
 0x299   :  { %2098 = vrcp.f32 %v361_v18  ;;  %v240_v19 = vpop.xlane.xlu1 %239 }
 0x29a   :  { %2100 = vrcp.f32 %v240_v19  ;;  %v1983_v19 = vld [vmem:[%s2936_s6 + $0x8] sm:$0xff] }
 0x29b   :  { %703 = vmatpush.bf16.msra.mxu0 %v1983_v19 }
 0x29f   :  { %v2099_v20 = vpop.eup %2098 }
 0x2a0   :  { %v2101_v22 = vpop.eup %2100  ;;  %v367_v23 = vmul.f32 %v2099_v20, %v2556_v35  ;;  %v1982_v20 = vld [vmem:[%s2936_s6] sm:$0xff] }
 0x2a1   :  { %v246_v24 = vmul.f32 %v2101_v22, %v2558_v36  ;;  %704 = vmatpush.bf16.msra.mxu0 %v1982_v20 }
 0x2a2   :  { %v369_v25 = vpack.c.bf16 %v367_v23, %v367_v23 }
 0x2a3   :  { %v248_v26 = vpack.c.bf16 %v246_v24, %v246_v24 }
 0x2a4   :  { %1849 = vmatmul.msk.bf16.vlgmr.msrb.gmra.mxu2 %vm174_vm1, %v369_v25 }
 0x2a5   :  { %1845 = vmatmul.msk.bf16.vlgmr.msra.gmra.mxu3 %vm174_vm1, %v248_v26 }
 0x2a6   :  { %407 = vmatpush.bf16.msra.mxu3 %v398_v27  ;;  %v243_v12 = vpop.xlane.xlu0 %242 }
 0x2a7   :  { %2102 = vrcp.f32 %v243_v12 }
 0x2a8   :  { %v364_v21 = vpop.xlane.xlu2 %363 }
 0x2a9   :  { %2104 = vrcp.f32 %v364_v21 }
 0x2ad   :  { %v2103_v28 = vpop.eup %2102 }
 0x2ae   :  { %v247_v29 = vmul.f32 %v2103_v28, %v2564_v49 }
 0x2af   :  { %v2105_v35 = vpop.eup %2104 }
 0x2b0   :  { %v486_v30 = vpop.permute.xlu2 %485  ;;  %v249_v33 = vpack.c.bf16 %v247_v29, %v247_v29  ;;  %v368_v36 = vmul.f32 %v2105_v35, %v2570_v53 }
 0x2b1   :  { %v491_v31 = vsel %vm255_vm2, %v486_v30, 0  ;;  %v507_v32 = vpop.permute.xlu1 %506 }
 0x2b2   :  { %500 = vmatpush.bf16.msra.mxu2 %v491_v31  ;;  %v512_v34 = vsel %vm255_vm2, %v507_v32, 0  ;;  %v370_v37 = vpack.c.bf16 %v368_v36, %v368_v36  ;;  %v2067_v36 = vld [vmem:[%s2937_s7] ss:$0 sm:$0xff] }
 0x2b5   :  { %1846 = vmatmul.msk.bf16.vlgmr.msrb.gmra.mxu3 %vm174_vm1, %v249_v33 }
 0x2b6   :  { %521 = vmatpush.bf16.msrb.mxu3 %v512_v34 }
 0x2c5   :  { %1850 = vmatmul.msk.bf16.vlgmr.msra.gmra.mxu3 %vm174_vm1, %v370_v37 }
 0x2e4   :  { %v478_v38 = vpop.xlane.xlu0 %477 }
 0x2e5   :  { %2106 = vrcp.f32 %v478_v38 }
 0x2e9   :  { %v475_v39 = vpop.xlane.xlu1 %474  ;;  %v592_v49 = vpop.xlane.xlu2 %591 }
 0x2ea   :  { %2108 = vrcp.f32 %v475_v39 }
 0x2eb   :  { %v2107_v40 = vpop.eup %2106 }
 0x2ec   :  { %v482_v41 = vmul.f32 %v2107_v40, %v2091_v8  ;;  %v589_v48 = vpop.xlane.xlu0 %588 }
 0x2ed   :  { %2110 = vrcp.f32 %v589_v48 }
 0x2ee   :  { %v484_v42 = vpack.c.bf16 %v482_v41, %v482_v41  ;;  %2112 = vrcp.f32 %v592_v49 }
 0x2f0   :  { %v2109_v43 = vpop.eup %2108  ;;  %1854 = vmatmul.msk.bf16.vlgmr.msrb.gmra.mxu3 %vm174_vm1, %v484_v42 }
 0x2f1   :  { %v481_v44 = vmul.f32 %v2109_v43, %v2095_v13 }
 0x2f3   :  { %v483_v45 = vpack.c.bf16 %v481_v44, %v481_v44  ;;  %v2111_v50 = vpop.eup %2110 }
 0x2f4   :  { %v2113_v51 = vpop.eup %2112  ;;  %v595_v52 = vmul.f32 %v2111_v50, %v2097_v16 }
 0x2f5   :  { %1853 = vmatmul.msk.bf16.vlgmr.msra.gmra.mxu2 %vm174_vm1, %v483_v45  ;;  %v596_v54 = vmul.f32 %v2113_v51, %v2580_v11  ;;  %v2339_v45 = vmov 32.0  }
 0x2f6   :  { %v597_v59 = vpack.c.bf16 %v595_v52, %v595_v52  ;;  %2114 = vrcp.f32 %v2339_v45 }
 0x2f7   :  { %v598_v60 = vpack.c.bf16 %v596_v54, %v596_v54 }
 0x2fc   :  { %v2115_v48 = vpop.eup %2114 }
 0x2fd   :  { %v720_v49 = vmul.f32 32.0, %v2115_v48  ;;  %vm724_vm5 = vweird.f32 %v2115_v48 }
 0x2ff   :  { %v600_v53 = vpop.permute.xlu0 %599  ;;  %v721_v50 = vsub.f32 1.0, %v720_v49 }
 0x300   :  { %v605_v55 = vsel %vm255_vm2, %v600_v53, 0 }
 0x301   :  { %v621_v56 = vpop.permute.xlu1 %620  ;;  %614 = vmatpush.bf16.msrb.mxu2 %v605_v55  ;;  %v722_v51 = vmul.f32 %v2115_v48, %v721_v50 }
 0x302   :  { %v626_v57 = vsel %vm255_vm2, %v621_v56, 0 }
 0x303   :  { %635 = vmatpush.bf16.msra.mxu3 %v626_v57  ;;  %v723_v52 = vadd.f32 %v2115_v48, %v722_v51 }
 0x305   :  { %1857 = vmatmul.msk.bf16.vlgmr.msrb.gmra.mxu2 %vm174_vm1, %v597_v59  ;;  %v2631_v53 = vsel %vm724_vm5, %v2115_v48, %v723_v52 }
 0x306   :  { %1858 = vmatmul.msk.bf16.vlgmr.msra.gmra.mxu3 %vm174_vm1, %v598_v60 }
 0x327   :  { %v388_v61 = vpop.f32.mrf.mxu2 }
 0x328   :  { %v268_v62 = vpop.f32.mrf.mxu3 }
 0x32f   :  { %v390_v63 = vpop.f32.mrf.mxu2 }
 0x330   :  { %v270_v0 = vpop.f32.mrf.mxu3 }
 0x331   :  { %v1985_v0 = vld [vmem:[%s2938_s8 + $0x8] sm:$0xff] }
 0x332   :  { %806 = vmatpush.bf16.msra.mxu1 %v1985_v0 }
 0x338   :  { %v289_v1 = vpop.f32.mrf.mxu3 }
 0x340   :  { %v291_v4 = vpop.f32.mrf.mxu3 }
 0x348   :  { %v409_v5 = vpop.f32.mrf.mxu3 }
 0x349   :  { %v2026_v6 = vpack.i.bf16 %v409_v5, %v388_v61  ;;  %v1984_v5 = vld [vmem:[%s2938_s8] sm:$0xff] }
 0x34a   :  { %807 = vmatpush.bf16.msra.mxu1 %v1984_v5 }
 0x34b   :  { %2027 = vrot.lane.b32.xlu0 %v2026_v6, %s2950_s21  ;;  %s1801_s21 = sshll.u32 %s2946_s16, 4  ;;  %s1802_s21 = int_to_ptr.hbm [resolvable:$true] %s1801_s21 }
 0x350   :  { %v411_v7 = vpop.f32.mrf.mxu3 }
 0x373   :  { %v523_v8 = vpop.f32.mrf.mxu3 }
 0x378   :  { %v502_v9 = vpop.f32.mrf.mxu2 }
 0x379   :  { %v2031_v10 = vpack.i.bf16 %v523_v8, %v502_v9 }
 0x37b   :  { %v525_v11 = vpop.f32.mrf.mxu3  ;;  %2032 = vrot.lane.b32.xlu1 %v2031_v10, %s2952_s28 }
 0x380   :  { %v504_v13 = vpop.f32.mrf.mxu2 }
 0x388   :  { %v616_v14 = vpop.f32.mrf.mxu2 }
 0x389   :  { %v637_v15 = vpop.f32.mrf.mxu3 }
 0x38a   :  { %v2036_v16 = vpack.i.bf16 %v637_v15, %v616_v14 }
 0x38c   :  { %2037 = vrot.lane.b32.xlu0 %v2036_v16, %s2951_s18 }
 0x390   :  { %v618_v17 = vpop.f32.mrf.mxu2 }
 0x391   :  { %v639_v18 = vpop.f32.mrf.mxu3 }
 0x3bd   :  { %v2028_v22 = vpop.permute.xlu0 %2027 }
 0x3be   :  { %v2030_v24 = vunpack.i.h.bf16 %v2028_v22  ;;  %v2029_v25 = vunpack.i.l.bf16 %v2028_v22 }
 0x3c0   :  { %v666_v21 = vsel %vm174_vm1, %v289_v1, %v2030_v24  ;;  %v665_v28 = vsel %vm174_vm1, %v268_v62, %v2029_v25 }
 0x3ed   :  { %v2033_v23 = vpop.permute.xlu1 %2032 }
 0x3ee   :  { %v2035_v26 = vunpack.i.h.bf16 %v2033_v23  ;;  %v2034_v27 = vunpack.i.l.bf16 %v2033_v23  ;;  %v2068_v23 = vld [vmem:[%s2942_s12] ss:$0 sm:$0xff] }
 0x3f0   :  { %v669_v31 = vsel %vm667_vm3, %v666_v21, %v2035_v26  ;;  %v668_v32 = vsel %vm667_vm3, %v665_v28, %v2034_v27  ;;  %v2069_v27 = vld [vmem:[#allocation7] ss:$0 sm:$0xff] }
 0x3fe   :  { %v2038_v12 = vpop.permute.xlu0 %2037 }
 0x3ff   :  { %v2040_v29 = vunpack.i.h.bf16 %v2038_v12  ;;  %v2039_v30 = vunpack.i.l.bf16 %v2038_v12 }
 0x401   :  { %v672_v33 = vsel %vm670_vm4, %v669_v31, %v2040_v29  ;;  %v671_v34 = vsel %vm670_vm4, %v668_v32, %v2039_v30  ;;  %v1989_v32 = vld [vmem:[%s2940_s10 + $0x18] sm:$0xff] }
 0x402   :  { %v673_v35 = vpack.c.bf16 %v672_v33, %v671_v34  ;;  %861 = vmatpush.bf16.msra.mxu2 %v1989_v32  ;;  %v1988_v33 = vld [vmem:[%s2940_s10 + $0x10] sm:$0xff]  ;;  %v1987_v34 = vld [vmem:[%s2940_s10 + $0x8] sm:$0xff] }
 0x404   :  { %1867 = vmatmul.msk.bf16.vlgmr.msra.gmra.mxu0 %vm145_vm0, %v673_v35  ;;  %v1986_v35 = vld [vmem:[%s2940_s10] sm:$0xff] }
 0x406   :  { %862 = vmatpush.bf16.msra.mxu2 %v1988_v33 }
 0x40a   :  { %863 = vmatpush.bf16.msra.mxu2 %v1987_v34  ;;  %v2074_v34 = vld [vmem:[%s2935_s5 + $0x1] ss:$0 sm:$0xff]  ;;  %s2964_s5 = smov 56  }
 0x40e   :  { %864 = vmatpush.bf16.msra.mxu2 %v1986_v35 }
 0x481   :  { %v706_v37 = vpop.f32.mrf.mxu0 }
 0x482   :  { %v707_v38 = vadd.f32 %v2067_v36, %v706_v37  ;;  %v2070_v37 = vld [vmem:[%s2939_s9] ss:$0 sm:$0xff] }
 0x484   :  { %v711_v39 = vadd.f32 %v707_v38, %v2460_v2 }
 0x486   :  { %v713_v40 = vsel %vm145_vm0, %v711_v39, 0.0 }
 0x487   :  { %714 = vadd.xlane.f32.xlu1 %v713_v40 }
 0x489   :  { %v708_v41 = vpop.f32.mrf.mxu0 }
 0x48a   :  { %v709_v42 = vadd.f32 %v2067_v36, %v708_v41 }
 0x48c   :  { %v712_v43 = vadd.f32 %v709_v42, %v2462_v3 }
 0x48e   :  { %v716_v44 = vsel %vm145_vm0, %v712_v43, 0.0 }
 0x48f   :  { %717 = vadd.xlane.f32.xlu2 %v716_v44  ;;  %v2071_v44 = vld [vmem:[%s2941_s11] ss:$0 sm:$0xff] }
 0x4fa   :  { %v715_v2 = vpop.xlane.xlu1 %714 }
 0x4fb   :  { %v726_v54 = vmul.f32 %v2631_v53, %v715_v2 }
 0x4fd   :  { %v728_v55 = vsub.f32 %v711_v39, %v726_v54 }
 0x4ff   :  { %v730_v56 = vmul.f32 %v728_v55, %v728_v55 }
 0x501   :  { %v732_v3 = vsel %vm145_vm0, %v730_v56, 0.0 }
 0x502   :  { %v718_v57 = vpop.xlane.xlu2 %717  ;;  %733 = vadd.xlane.f32.xlu0 %v732_v3 }
 0x503   :  { %v727_v59 = vmul.f32 %v2631_v53, %v718_v57 }
 0x505   :  { %v729_v60 = vsub.f32 %v712_v43, %v727_v59 }
 0x507   :  { %v731_v61 = vmul.f32 %v729_v60, %v729_v60 }
 0x509   :  { %v735_v62 = vsel %vm145_vm0, %v731_v61, 0.0 }
 0x50a   :  { %736 = vadd.xlane.f32.xlu2 %v735_v62 }
 0x575   :  { %v734_v63 = vpop.xlane.xlu0 %733 }
 0x576   :  { %v738_v1 = vmul.f32 %v734_v63, %v2631_v53 }
 0x578   :  { %v740_v4 = vadd.f32 1e-05, %v738_v1 }
 0x57a   :  { %2116 = vrsqrt.f32 %v740_v4  ;;  %vm748_vm7 = vweird.f32 %v740_v4 }
 0x57d   :  { %v737_v6 = vpop.xlane.xlu2 %736 }
 0x57e   :  { %v739_v7 = vmul.f32 %v737_v6, %v2631_v53 }
 0x580   :  { %v2117_v8 = vpop.eup %2116  ;;  %v741_v9 = vadd.f32 1e-05, %v739_v7  ;;  %v1990_v7 = vld [vmem:[%s2934_s4 + $0x10] sm:$0xff] }
 0x581   :  { %v743_v10 = vmul.f32 %v2117_v8, %v740_v4  ;;  %vm749_vm6 = vweird.f32 %v2117_v8  ;;  %v1991_v4 = vld [vmem:[%s2934_s4 + $0x18] sm:$0xff]  ;;  %s1814_s4 = sshll.u32 %s2947_s17, 4  ;;  %s1815_s4 = int_to_ptr.hbm [resolvable:$true] %s1814_s4 }
 0x582   :  { %2118 = vrsqrt.f32 %v741_v9  ;;  %vm750_vm8 = vmor %vm748_vm7, %vm749_vm6  ;;  %vm758_vm10 = vweird.f32 %v741_v9  ;;  %961 = vmatpush.bf16.msrb.mxu3 %v1991_v4 }
 0x583   :  { %v744_v11 = vmul.f32 %v2117_v8, %v743_v10 }
 0x585   :  { %v745_v13 = vmul.f32 0.5, %v744_v11 }
 0x586   :  { %962 = vmatpush.bf16.msrb.mxu3 %v1990_v7 }
 0x587   :  { %v746_v14 = vsub.f32 1.5, %v745_v13 }
 0x588   :  { %v2119_v15 = vpop.eup %2118 }
 0x589   :  { %v747_v16 = vmul.f32 %v2117_v8, %v746_v14  ;;  %v753_v17 = vmul.f32 %v2119_v15, %v741_v9  ;;  %vm759_vm9 = vweird.f32 %v2119_v15 }
 0x58a   :  { %vm760_vm11 = vmor %vm758_vm10, %vm759_vm9 }
 0x58b   :  { %v754_v18 = vmul.f32 %v2119_v15, %v753_v17  ;;  %v751_v19 = vsel %vm750_vm8, %v2117_v8, %v747_v16  ;;  %vm1739_vm8 = vcmask 60416  }
 0x58c   :  { %v762_v24 = vmul.f32 %v751_v19, %v728_v55 }
 0x58d   :  { %v755_v20 = vmul.f32 0.5, %v754_v18 }
 0x58e   :  { %v768_v12 = vmul.f32 %v2068_v23, %v762_v24 }
 0x58f   :  { %v756_v22 = vsub.f32 1.5, %v755_v20 }
 0x590   :  { %v774_v29 = vadd.f32 %v2069_v27, %v768_v12 }
 0x591   :  { %v757_v25 = vmul.f32 %v2119_v15, %v756_v22 }
 0x593   :  { %v761_v26 = vsel %vm760_vm11, %v2119_v15, %v757_v25  ;;  %v2072_v25 = vld [vmem:[%s2944_s14] ss:$0 sm:$0xff] }
 0x594   :  { %v763_v21 = vmul.f32 %v761_v26, %v729_v60 }
 0x596   :  { %v769_v28 = vmul.f32 %v2068_v23, %v763_v21  ;;  %v2073_v21 = vld [vmem:[#allocation8] ss:$0 sm:$0xff] }
 0x598   :  { %v775_v30 = vadd.f32 %v2069_v27, %v769_v28 }
 0x59a   :  { %v776_v31 = vpack.c.bf16 %v775_v30, %v774_v29 }
 0x59c   :  { %1876 = vmatmul.msk.bf16.vlgmr.msra.gmra.mxu1 %vm145_vm0, %v776_v31 }
 0x619   :  { %v809_v36 = vpop.f32.mrf.mxu1 }
 0x61a   :  { %v810_v38 = vadd.f32 %v2070_v37, %v809_v36 }
 0x61c   :  { %v814_v41 = vmax.f32 %v810_v38, 0.0 }
 0x621   :  { %v811_v39 = vpop.f32.mrf.mxu1 }
 0x622   :  { %v812_v40 = vadd.f32 %v2070_v37, %v811_v39 }
 0x624   :  { %v815_v42 = vmax.f32 %v812_v40, 0.0 }
 0x626   :  { %v816_v43 = vpack.c.bf16 %v815_v42, %v814_v41 }
 0x628   :  { %1893 = vmatmul.msk.bf16.vlgmr.msra.gmra.mxu2 %vm853_vm12, %v816_v43 }
 0x6ab   :  { %v866_v45 = vpop.f32.mrf.mxu2 }
 0x6ac   :  { %v867_v48 = vadd.f32 %v2071_v44, %v866_v45 }
 0x6ae   :  { %v871_v49 = vadd.f32 %v867_v48, %v774_v29 }
 0x6b0   :  { %v873_v50 = vsel %vm145_vm0, %v871_v49, 0.0 }
 0x6b1   :  { %874 = vadd.xlane.f32.xlu2 %v873_v50 }
 0x6b3   :  { %v868_v51 = vpop.f32.mrf.mxu2 }
 0x6b4   :  { %v869_v52 = vadd.f32 %v2071_v44, %v868_v51 }
 0x6b6   :  { %v872_v2 = vadd.f32 %v869_v52, %v775_v30 }
 0x6b8   :  { %v876_v54 = vsel %vm145_vm0, %v872_v2, 0.0 }
 0x6b9   :  { %877 = vadd.xlane.f32.xlu2 %v876_v54 }
 0x724   :  { %v875_v55 = vpop.xlane.xlu2 %874 }
 0x725   :  { %v879_v56 = vmul.f32 %v875_v55, %v2631_v53 }
 0x727   :  { %v881_v3 = vsub.f32 %v871_v49, %v879_v56 }
 0x729   :  { %v883_v57 = vmul.f32 %v881_v3, %v881_v3 }
 0x72b   :  { %v885_v59 = vsel %vm145_vm0, %v883_v57, 0.0 }
 0x72c   :  { %886 = vadd.xlane.f32.xlu2 %v885_v59  ;;  %v878_v60 = vpop.xlane.xlu2 %877 }
 0x72d   :  { %v880_v61 = vmul.f32 %v878_v60, %v2631_v53 }
 0x72f   :  { %v882_v62 = vsub.f32 %v872_v2, %v880_v61 }
 0x731   :  { %v884_v63 = vmul.f32 %v882_v62, %v882_v62 }
 0x733   :  { %v888_v0 = vsel %vm145_vm0, %v884_v63, 0.0 }
 0x734   :  { %889 = vadd.xlane.f32.xlu1 %v888_v0 }
 0x79f   :  { %v887_v1 = vpop.xlane.xlu2 %886 }
 0x7a0   :  { %v891_v5 = vmul.f32 %v887_v1, %v2631_v53 }
 0x7a2   :  { %v893_v6 = vadd.f32 1e-05, %v891_v5 }
 0x7a4   :  { %2120 = vrsqrt.f32 %v893_v6  ;;  %vm901_vm14 = vweird.f32 %v893_v6 }
 0x7a7   :  { %v890_v8 = vpop.xlane.xlu1 %889 }
 0x7a8   :  { %v892_v9 = vmul.f32 %v890_v8, %v2631_v53 }
 0x7aa   :  { %v2121_v10 = vpop.eup %2120  ;;  %v894_v11 = vadd.f32 1e-05, %v892_v9 }
 0x7ab   :  { %v896_v13 = vmul.f32 %v2121_v10, %v893_v6  ;;  %vm902_vm13 = vweird.f32 %v2121_v10 }
 0x7ac   :  { %2122 = vrsqrt.f32 %v894_v11  ;;  %vm903_vm15 = vmor %vm901_vm14, %vm902_vm13  ;;  %vm911_vm6 = vweird.f32 %v894_v11 }
 0x7ad   :  { %v897_v14 = vmul.f32 %v2121_v10, %v896_v13 }
 0x7af   :  { %v898_v15 = vmul.f32 0.5, %v897_v14 }
 0x7b1   :  { %v899_v16 = vsub.f32 1.5, %v898_v15 }
 0x7b2   :  { %v2123_v17 = vpop.eup %2122 }
 0x7b3   :  { %v900_v18 = vmul.f32 %v2121_v10, %v899_v16  ;;  %v906_v19 = vmul.f32 %v2123_v17, %v894_v11  ;;  %vm912_vm5 = vweird.f32 %v2123_v17 }
 0x7b4   :  { %vm913_vm7 = vmor %vm911_vm6, %vm912_vm5 }
 0x7b5   :  { %v907_v20 = vmul.f32 %v2123_v17, %v906_v19  ;;  %v904_v22 = vsel %vm903_vm15, %v2121_v10, %v900_v18 }
 0x7b6   :  { %v915_v26 = vmul.f32 %v904_v22, %v881_v3 }
 0x7b7   :  { %v908_v23 = vmul.f32 0.5, %v907_v20 }
 0x7b8   :  { %v921_v28 = vmul.f32 %v2072_v25, %v915_v26 }
 0x7b9   :  { %v909_v24 = vsub.f32 1.5, %v908_v23 }
 0x7ba   :  { %v2685_v31 = vadd.f32 %v2073_v21, %v921_v28 }
 0x7bb   :  { %v910_v27 = vmul.f32 %v2123_v17, %v909_v24 }
 0x7bd   :  { %v914_v12 = vsel %vm913_vm7, %v2123_v17, %v910_v27 }
 0x7be   :  { %v916_v29 = vmul.f32 %v914_v12, %v882_v62 }
 0x7c0   :  { %v922_v30 = vmul.f32 %v2072_v25, %v916_v29 }
 0x7c2   :  { %v2687_v32 = vadd.f32 %v2073_v21, %v922_v30 }
 0x7c4   :  { %v929_v33 = vpack.c.bf16 %v2687_v32, %v2685_v31 }
 0x7c6   :  { %1907 = vmatmul.msk.bf16.vlgmr.msrb.gmra.mxu3 %vm145_vm0, %v929_v33 }
 0x849   :  { %v964_v35 = vpop.f32.mrf.mxu3 }
 0x84a   :  { %v965_v36 = vadd.f32 %v2074_v34, %v964_v35 }
 0x84c   :  { %v969_v37 = vmul.f32 0.35355338, %v965_v36  ;;  %v973_v38 = vpack.c.bf16 %v965_v36, %v965_v36 }
 0x84e   :  { %v976_v39 = vunpack.c.l.b16 %v973_v38  ;;  %v971_v40 = vpack.c.bf16 %v969_v37, %v969_v37 }
 0x850   :  { %v2695_v41 = vpack.c.b16 %v976_v39, %v976_v39  ;;  %v1094_v48 = vunpack.c.l.b16 %v971_v40 }
 0x851   :  { %v966_v42 = vpop.f32.mrf.mxu3 }
 0x852   :  { %v967_v43 = vadd.f32 %v2074_v34, %v966_v42  ;;  %1098 = vrot.lane.b32.xlu1 %v2695_v41, %s2327_s2  ;;  %978 = vrot.lane.b32.xlu2 %v2695_v41, %s2328_s23  ;;  %v1095_v52 = vpack.c.b16 %v1094_v48, %v1094_v48 }
 0x854   :  { %v970_v44 = vmul.f32 0.35355338, %v967_v43  ;;  %v974_v45 = vpack.c.bf16 %v967_v43, %v967_v43 }
 0x856   :  { %v972_v49 = vpack.c.bf16 %v970_v44, %v970_v44  ;;  %v1000_v50 = vunpack.c.l.b16 %v974_v45 }
 0x858   :  { %v2701_v51 = vpack.c.b16 %v1000_v50, %v1000_v50  ;;  %v1120_v2 = vunpack.c.l.b16 %v972_v49 }
 0x85a   :  { %1002 = vrot.lane.b32.xlu0 %v2701_v51, %s2328_s23  ;;  %1096 = vrot.lane.b32.xlu2 %v1095_v52, %s2329_s24  ;;  %v1121_v54 = vpack.c.b16 %v1120_v2, %v1120_v2  ;;  %s2966_s23 = smov 40  }
 0x85c   :  { %1122 = vrot.lane.b32.xlu1 %v1121_v54, %s2329_s24  ;;  %s2967_s24 = smov 8  }
 0x862   :  { %1124 = vrot.lane.b32.xlu0 %v2701_v51, %s2327_s2  ;;  %1240 = vrot.lane.b32.xlu2 %v2701_v51, %s2330_s25  ;;  %s2965_s2 = smov 48  }
 0x864   :  { %1215 = vrot.lane.b32.xlu1 %v1095_v52, %s2331_s27 }
 0x86a   :  { %1217 = vrot.lane.b32.xlu0 %v2695_v41, %s2330_s25  ;;  %1333 = vrot.lane.b32.xlu2 %v2695_v41, %s2332_s29  ;;  %s2968_s25 = smov 16  }
 0x86c   :  { %1356 = vrot.lane.b32.xlu1 %v2701_v51, %s2332_s29 }
 0x872   :  { %1238 = vrot.lane.b32.xlu0 %v1121_v54, %s2331_s27  ;;  %1354 = vrot.lane.b32.xlu2 %v1121_v54, %s2333_s26  ;;  %s2969_s27 = smov 24  }
 0x87a   :  { %1331 = vrot.lane.b32.xlu0 %v1095_v52, %s2333_s26 }
 0x882   :  { %1051 = vrot.lane.b32.xlu0 %v2695_v41, %s2334_s1 }
 0x8ac   :  { %v979_v55 = vpop.permute.xlu2 %978 }
 0x8ad   :  { %v984_v56 = vsel %vm174_vm1, %v979_v55, 0 }
 0x8ae   :  { %993 = vmatpush.bf16.xpose.msrb.mxu0 %v984_v56 }
 0x8b4   :  { %v1097_v59 = vpop.permute.xlu2 %1096 }
 0x8b5   :  { %1908 = vmatmul.msk.bf16.vlgmr.msrb.gmra.mxu0 %vm174_vm1, %v971_v40 }
 0x8bc   :  { %v1241_v63 = vpop.permute.xlu2 %1240 }
 0x8bd   :  { %v1246_v4 = vsel %vm174_vm1, %v1241_v63, 0 }
 0x8c4   :  { %v1099_v3 = vpop.permute.xlu1 %1098  ;;  %v1334_v6 = vpop.permute.xlu2 %1333 }
 0x8c5   :  { %v1104_v57 = vsel %vm174_vm1, %v1099_v3, 0  ;;  %v1339_v9 = vsel %vm174_vm1, %v1334_v6, 0 }
 0x8c6   :  { %1113 = vmatpush.bf16.xpose.msra.mxu0 %v1104_v57 }
 0x8cc   :  { %v1003_v60 = vpop.permute.xlu0 %1002  ;;  %v1355_v17 = vpop.permute.xlu2 %1354 }
 0x8cd   :  { %v1008_v61 = vsel %vm174_vm1, %v1003_v60, 0  ;;  %1912 = vmatmul.msk.bf16.vlgmr.msra.gmra.mxu0 %vm174_vm1, %v1097_v59  ;;  %v2164_v59 = vld [vmem:[#allocation5] sm:$0xff] }
 0x8ce   :  { %1017 = vmatpush.bf16.xpose.msrb.mxu1 %v1008_v61  ;;  %v1123_v62 = vpop.permute.xlu1 %1122 }
 0x8d4   :  { %v1125_v0 = vpop.permute.xlu0 %1124 }
 0x8d5   :  { %v1130_v1 = vsel %vm174_vm1, %v1125_v0, 0  ;;  %1909 = vmatmul.msk.bf16.vlgmr.msrb.gmra.mxu1 %vm174_vm1, %v972_v49 }
 0x8d6   :  { %1139 = vmatpush.bf16.xpose.msra.mxu1 %v1130_v1  ;;  %v1216_v5 = vpop.permute.xlu1 %1215 }
 0x8dc   :  { %v1218_v7 = vpop.permute.xlu0 %1217 }
 0x8dd   :  { %v1223_v8 = vsel %vm174_vm1, %v1218_v7, 0 }
 0x8de   :  { %1255 = vmatpush.bf16.xpose.msrb.mxu1 %v1246_v4  ;;  %1232 = vmatpush.bf16.xpose.msrb.mxu0 %v1223_v8  ;;  %v1357_v10 = vpop.permute.xlu1 %1356 }
 0x8df   :  { %v1362_v13 = vsel %vm174_vm1, %v1357_v10, 0 }
 0x8e4   :  { %v1239_v11 = vpop.permute.xlu0 %1238 }
 0x8e5   :  { %1913 = vmatmul.msk.bf16.vlgmr.msra.gmra.mxu1 %vm174_vm1, %v1123_v62  ;;  %1916 = vmatmul.msk.bf16.vlgmr.msrb.gmra.mxu0 %vm174_vm1, %v1216_v5 }
 0x8e6   :  { %1348 = vmatpush.bf16.xpose.msra.mxu0 %v1339_v9  ;;  %1371 = vmatpush.bf16.xpose.msra.mxu1 %v1362_v13 }
 0x8ec   :  { %v1332_v14 = vpop.permute.xlu0 %1331 }
 0x8f4   :  { %v1052_v15 = vpop.permute.xlu0 %1051 }
 0x8f5   :  { %v1057_v16 = vsel %vm255_vm2, %v1052_v15, 0  ;;  %1917 = vmatmul.msk.bf16.vlgmr.msrb.gmra.mxu1 %vm174_vm1, %v1239_v11  ;;  %1920 = vmatmul.msk.bf16.vlgmr.msra.gmra.mxu0 %vm174_vm1, %v1332_v14 }
 0x8f6   :  { %1066 = vmatpush.bf16.msrb.mxu2 %v1057_v16 }
 0x905   :  { %1921 = vmatmul.msk.bf16.vlgmr.msra.gmra.mxu1 %vm174_vm1, %v1355_v17 }
 0x932   :  { %v995_v18 = vpop.f32.mrf.mxu0 }
 0x933   :  { %v996_v19 = vadd.f32 %v995_v18, %v2512_v46 }
 0x935   :  { %v1023_v20 = vadd.f32 %v2517_v47, %v996_v19 }
 0x937   :  { %v1025_v22 = vsel %vm174_vm1, %v1023_v20, -inf }
 0x938   :  { %1026 = vmax.xlane.f32.xlu1 %v1025_v22 }
 0x93a   :  { %v997_v23 = vpop.f32.mrf.mxu0 }
 0x94a   :  { %v1115_v24 = vpop.f32.mrf.mxu0 }
 0x94b   :  { %v1116_v25 = vadd.f32 %v1115_v24, %v2512_v46 }
 0x94d   :  { %v1145_v26 = vadd.f32 %v2517_v47, %v1116_v25 }
 0x94f   :  { %v1147_v27 = vsel %vm174_vm1, %v1145_v26, -inf }
 0x950   :  { %1148 = vmax.xlane.f32.xlu2 %v1147_v27 }
 0x952   :  { %v1019_v12 = vpop.f32.mrf.mxu1  ;;  %v1117_v21 = vpop.f32.mrf.mxu0 }
 0x953   :  { %v1020_v28 = vadd.f32 %v1019_v12, %v2512_v46 }
 0x955   :  { %v1024_v29 = vadd.f32 %v2528_v58, %v1020_v28 }
 0x957   :  { %v1028_v30 = vsel %vm174_vm1, %v1024_v29, -inf }
 0x958   :  { %1029 = vmax.xlane.f32.xlu0 %v1028_v30 }
 0x95a   :  { %v1021_v33 = vpop.f32.mrf.mxu1 }
 0x962   :  { %v1141_v34 = vpop.f32.mrf.mxu1  ;;  %v1234_v35 = vpop.f32.mrf.mxu0 }
 0x963   :  { %v1142_v36 = vadd.f32 %v1141_v34, %v2512_v46  ;;  %v1235_v37 = vadd.f32 %v1234_v35, %v2512_v46 }
 0x965   :  { %v1261_v38 = vadd.f32 %v2517_v47, %v1235_v37  ;;  %v1146_v39 = vadd.f32 %v2528_v58, %v1142_v36 }
 0x967   :  { %v1263_v40 = vsel %vm174_vm1, %v1261_v38, -inf  ;;  %v1150_v42 = vsel %vm174_vm1, %v1146_v39, -inf }
 0x968   :  { %1264 = vmax.xlane.f32.xlu0 %v1263_v40  ;;  %1151 = vmax.xlane.f32.xlu1 %v1150_v42 }
 0x96a   :  { %v1143_v43 = vpop.f32.mrf.mxu1  ;;  %v1236_v44 = vpop.f32.mrf.mxu0 }
 0x972   :  { %v1257_v45 = vpop.f32.mrf.mxu1  ;;  %v1350_v48 = vpop.f32.mrf.mxu0 }
 0x973   :  { %v1258_v49 = vadd.f32 %v1257_v45, %v2512_v46  ;;  %v1351_v50 = vadd.f32 %v1350_v48, %v2512_v46 }
 0x975   :  { %v1262_v52 = vadd.f32 %v2528_v58, %v1258_v49  ;;  %v2759_v2 = vadd.f32 %v2517_v47, %v1351_v50 }
 0x977   :  { %v1266_v54 = vsel %vm174_vm1, %v1262_v52, -inf  ;;  %v1379_v55 = vsel %vm174_vm1, %v2759_v2, -inf }
 0x978   :  { %1267 = vmax.xlane.f32.xlu2 %v1266_v54  ;;  %1380 = vmax.xlane.f32.xlu1 %v1379_v55 }
 0x97a   :  { %v1259_v56 = vpop.f32.mrf.mxu1  ;;  %v1352_v3 = vpop.f32.mrf.mxu0 }
 0x982   :  { %v1373_v57 = vpop.f32.mrf.mxu1 }
 0x983   :  { %v1374_v60 = vadd.f32 %v2164_v59, %v1373_v57 }
 0x985   :  { %v1378_v61 = vadd.f32 %v2528_v58, %v1374_v60 }
 0x987   :  { %v1382_v46 = vsel %vm174_vm1, %v1378_v61, -inf }
 0x988   :  { %1383 = vmax.xlane.f32.xlu0 %v1382_v46 }
 0x98a   :  { %v1375_v62 = vpop.f32.mrf.mxu1 }
 0x990   :  { %1072 = vrot.lane.b32.xlu2 %v2701_v51, %s2334_s1 }
 0x991   :  { %1194 = vrot.lane.b32.xlu1 %v2701_v51, %s2964_s5 }
 0x999   :  { %1289 = vrot.lane.b32.xlu1 %v2695_v41, %s2965_s2 }
 0x99c   :  { %1173 = vrot.lane.b32.xlu0 %v2695_v41, %s2964_s5  ;;  %s2970_s5 = smov 1  }
 0x9ab   :  { %v1027_v47 = vpop.xlane.xlu1 %1026 }
 0x9ac   :  { %v1031_v63 = vsub.f32 %v1023_v20, %v1027_v47 }
 0x9ae   :  { %v1033_v0 = vmul.f32 1.442695, %v1031_v63 }
 0x9b0   :  { %2124 = vpow2.f32 %v1033_v0 }
 0x9b6   :  { %v2774_v58 = vpop.eup %2124 }
 0x9b7   :  { %v1037_v1 = vsel %vm174_vm1, %v2774_v58, 0.0 }
 0x9b9   :  { %1038 = vadd.xlane.f32.xlu2 %v1037_v1 }
 0x9c3   :  { %v1149_v4 = vpop.xlane.xlu2 %1148 }
 0x9c4   :  { %v1153_v7 = vsub.f32 %v1145_v26, %v1149_v4 }
 0x9c6   :  { %v1155_v9 = vmul.f32 1.442695, %v1153_v7 }
 0x9cb   :  { %v1030_v5 = vpop.xlane.xlu0 %1029 }
 0x9cc   :  { %v1032_v6 = vsub.f32 %v1024_v29, %v1030_v5 }
 0x9ce   :  { %v1035_v8 = vmul.f32 1.442695, %v1032_v6 }
 0x9d0   :  { %2126 = vpow2.f32 %v1035_v8 }
 0x9d1   :  { %2128 = vpow2.f32 %v1155_v9 }
 0x9d6   :  { %v2778_v10 = vpop.eup %2126 }
 0x9d7   :  { %v1040_v11 = vsel %vm174_vm1, %v2778_v10, 0.0  ;;  %v2782_v15 = vpop.eup %2128 }
 0x9d8   :  { %1041 = vadd.xlane.f32.xlu1 %v1040_v11  ;;  %v1159_v20 = vsel %vm174_vm1, %v2782_v15, 0.0 }
 0x9db   :  { %v1265_v13 = vpop.xlane.xlu0 %1264  ;;  %v1152_v14 = vpop.xlane.xlu1 %1151 }
 0x9dc   :  { %v1269_v16 = vsub.f32 %v1261_v38, %v1265_v13  ;;  %v1154_v17 = vsub.f32 %v1146_v39, %v1152_v14 }
 0x9de   :  { %v1271_v18 = vmul.f32 1.442695, %v1269_v16  ;;  %v1157_v19 = vmul.f32 1.442695, %v1154_v17 }
 0x9e0   :  { %2130 = vpow2.f32 %v1271_v18  ;;  %1160 = vadd.xlane.f32.xlu1 %v1159_v20 }
 0x9e1   :  { %2132 = vpow2.f32 %v1157_v19 }
 0x9e6   :  { %v2786_v22 = vpop.eup %2130 }
 0x9e7   :  { %v2788_v23 = vpop.eup %2132  ;;  %v1275_v24 = vsel %vm174_vm1, %v2786_v22, 0.0 }
 0x9e8   :  { %1276 = vadd.xlane.f32.xlu2 %v1275_v24  ;;  %v1162_v25 = vsel %vm174_vm1, %v2788_v23, 0.0 }
 0x9e9   :  { %1163 = vadd.xlane.f32.xlu1 %v1162_v25 }
 0x9eb   :  { %v1268_v26 = vpop.xlane.xlu2 %1267  ;;  %v1381_v33 = vpop.xlane.xlu1 %1380 }
 0x9ec   :  { %v1270_v27 = vsub.f32 %v1262_v52, %v1268_v26  ;;  %v1385_v44 = vsub.f32 %v2759_v2, %v1381_v33 }
 0x9ee   :  { %v1273_v12 = vmul.f32 1.442695, %v1270_v27  ;;  %v1387_v45 = vmul.f32 1.442695, %v1385_v44 }
 0x9f0   :  { %2134 = vpow2.f32 %v1273_v12 }
 0x9f3   :  { %v1073_v21 = vpop.permute.xlu2 %1072 }
 0x9f4   :  { %v1078_v28 = vsel %vm255_vm2, %v1073_v21, 0 }
 0x9f5   :  { %1087 = vmatpush.bf16.msra.mxu3 %v1078_v28 }
 0x9f6   :  { %v2795_v29 = vpop.eup %2134 }
 0x9f7   :  { %v1278_v30 = vsel %vm174_vm1, %v2795_v29, 0.0 }
 0x9f8   :  { %1279 = vadd.xlane.f32.xlu0 %v1278_v30 }
 0x9fb   :  { %v1384_v34 = vpop.xlane.xlu0 %1383 }
 0x9fc   :  { %v1386_v35 = vsub.f32 %v1378_v61, %v1384_v34 }
 0x9fe   :  { %v1389_v36 = vmul.f32 1.442695, %v1386_v35 }
 0xa00   :  { %2136 = vpow2.f32 %v1389_v36 }
 0xa01   :  { %2138 = vpow2.f32 %v1387_v45 }
 0xa02   :  { %1310 = vrot.lane.b32.xlu1 %v2701_v51, %s2965_s2 }
 0xa03   :  { %v1195_v37 = vpop.permute.xlu1 %1194 }
 0xa04   :  { %v1200_v38 = vsel %vm255_vm2, %v1195_v37, 0 }
 0xa05   :  { %1209 = vmatpush.bf16.msrb.mxu3 %v1200_v38 }
 0xa06   :  { %v2802_v39 = vpop.eup %2136 }
 0xa07   :  { %v1394_v40 = vsel %vm174_vm1, %v2802_v39, 0.0  ;;  %v2812_v48 = vpop.eup %2138 }
 0xa08   :  { %1395 = vadd.xlane.f32.xlu2 %v1394_v40  ;;  %v1391_v49 = vsel %vm174_vm1, %v2812_v48, 0.0 }
 0xa0b   :  { %v1290_v54 = vpop.permute.xlu1 %1289 }
 0xa0c   :  { %1405 = vrot.lane.b32.xlu0 %v2695_v41, %s2966_s23  ;;  %v1295_v2 = vsel %vm255_vm2, %v1290_v54, 0 }
 0xa0e   :  { %v1174_v42 = vpop.permute.xlu0 %1173 }
 0xa0f   :  { %v1179_v43 = vsel %vm255_vm2, %v1174_v42, 0 }
 0xa10   :  { %1188 = vmatpush.bf16.msra.mxu2 %v1179_v43 }
 0xa20   :  { %1426 = vrot.lane.b32.xlu2 %v2701_v51, %s2966_s23 }
 0xa2c   :  { %1392 = vadd.xlane.f32.xlu1 %v1391_v49  ;;  %v1039_v50 = vpop.xlane.xlu2 %1038 }
 0xa2d   :  { %2140 = vrcp.f32 %v1039_v50 }
 0xa33   :  { %v2141_v41 = vpop.eup %2140 }
 0xa34   :  { %v1045_v52 = vmul.f32 %v2141_v41, %v2774_v58 }
 0xa36   :  { %v1049_v55 = vpack.c.bf16 %v1045_v52, %v1045_v52 }
 0xa38   :  { %1910 = vmatmul.msk.bf16.vlgmr.msrb.gmra.mxu2 %vm174_vm1, %v1049_v55 }
 0xa39   :  { %1304 = vmatpush.bf16.msrb.mxu2 %v1295_v2 }
 0xa4b   :  { %v1042_v51 = vpop.xlane.xlu1 %1041 }
 0xa4c   :  { %2142 = vrcp.f32 %v1042_v51 }
 0xa52   :  { %v2143_v56 = vpop.eup %2142 }
 0xa53   :  { %v1046_v3 = vmul.f32 %v2143_v56, %v2778_v10  ;;  %v1161_v57 = vpop.xlane.xlu1 %1160 }
 0xa54   :  { %2144 = vrcp.f32 %v1161_v57  ;;  %v1992_v57 = vld [vmem:[%s2936_s6 + $0x10] sm:$0xff] }
 0xa55   :  { %v1050_v59 = vpack.c.bf16 %v1046_v3, %v1046_v3 }
 0xa57   :  { %1911 = vmatmul.msk.bf16.vlgmr.msra.gmra.mxu3 %vm174_vm1, %v1050_v59 }
 0xa5a   :  { %v2145_v60 = vpop.eup %2144 }
 0xa5b   :  { %v1167_v61 = vmul.f32 %v2145_v60, %v2782_v15  ;;  %v1277_v63 = vpop.xlane.xlu2 %1276 }
 0xa5c   :  { %v1164_v46 = vpop.xlane.xlu1 %1163 }
 0xa5d   :  { %v1169_v62 = vadd.f32 %v1167_v61, %v1045_v52  ;;  %v1171_v47 = vpack.c.bf16 %v1167_v61, %v1167_v61  ;;  %2146 = vrcp.f32 %v1164_v46 }
 0xa5e   :  { %2148 = vrcp.f32 %v1277_v63 }
 0xa5f   :  { %1914 = vmatmul.msk.bf16.vlgmr.msra.gmra.mxu2 %vm174_vm1, %v1171_v47 }
 0xa63   :  { %v2147_v0 = vpop.eup %2146 }
 0xa64   :  { %v1168_v58 = vmul.f32 %v2147_v0, %v2788_v23  ;;  %v2149_v1 = vpop.eup %2148 }
 0xa65   :  { %v1283_v5 = vmul.f32 %v2149_v1, %v2786_v22 }
 0xa66   :  { %v1172_v4 = vpack.c.bf16 %v1168_v58, %v1168_v58  ;;  %v1170_v17 = vadd.f32 %v1168_v58, %v1046_v3  ;;  %v1993_v3 = vld [vmem:[%s2936_s6 + $0x18] sm:$0xff] }
 0xa67   :  { %v1287_v7 = vpack.c.bf16 %v1283_v5, %v1283_v5  ;;  %v1285_v28 = vadd.f32 %v1283_v5, %v1169_v62  ;;  %1509 = vmatpush.bf16.msrb.mxu0 %v1993_v3 }
 0xa68   :  { %1915 = vmatmul.msk.bf16.vlgmr.msrb.gmra.mxu3 %vm174_vm1, %v1172_v4 }
 0xa6b   :  { %v1280_v6 = vpop.xlane.xlu0 %1279  ;;  %1510 = vmatpush.bf16.msrb.mxu0 %v1992_v57 }
 0xa6c   :  { %2150 = vrcp.f32 %v1280_v6 }
 0xa6f   :  { %1918 = vmatmul.msk.bf16.vlgmr.msrb.gmra.mxu2 %vm174_vm1, %v1287_v7 }
 0xa72   :  { %v2151_v8 = vpop.eup %2150 }
 0xa73   :  { %v1284_v9 = vmul.f32 %v2151_v8, %v2795_v29 }
 0xa74   :  { %v1311_v10 = vpop.permute.xlu1 %1310 }
 0xa75   :  { %v1288_v11 = vpack.c.bf16 %v1284_v9, %v1284_v9  ;;  %v1316_v13 = vsel %vm255_vm2, %v1311_v10, 0  ;;  %v1286_v19 = vadd.f32 %v1284_v9, %v1170_v17  ;;  %v2075_v10 = vld [vmem:[%s2937_s7 + $0x1] ss:$0 sm:$0xff] }
 0xa76   :  { %1325 = vmatpush.bf16.msra.mxu3 %v1316_v13 }
 0xa79   :  { %1919 = vmatmul.msk.bf16.vlgmr.msra.gmra.mxu3 %vm174_vm1, %v1288_v11 }
 0xa7b   :  { %v1396_v14 = vpop.xlane.xlu2 %1395 }
 0xa7c   :  { %2152 = vrcp.f32 %v1396_v14 }
 0xa7e   :  { %v1406_v15 = vpop.permute.xlu0 %1405 }
 0xa7f   :  { %v1411_v16 = vsel %vm255_vm2, %v1406_v15, 0 }
 0xa80   :  { %1420 = vmatpush.bf16.msra.mxu2 %v1411_v16 }
 0xa82   :  { %v2153_v18 = vpop.eup %2152 }
 0xa83   :  { %v1400_v20 = vmul.f32 %v2153_v18, %v2802_v39  ;;  %v1427_v22 = vpop.permute.xlu2 %1426 }
 0xa84   :  { %v1432_v23 = vsel %vm255_vm2, %v1427_v22, 0 }
 0xa85   :  { %v1402_v24 = vadd.f32 %v1400_v20, %v1286_v19  ;;  %v1404_v25 = vpack.c.bf16 %v1400_v20, %v1400_v20  ;;  %1441 = vmatpush.bf16.msrb.mxu3 %v1432_v23 }
 0xa87   :  { %v1736_v26 = vmul.f32 0.25, %v1402_v24 }
 0xa89   :  { %v1738_v27 = vpack.c.bf16 %v1736_v26, %v1736_v26  ;;  %1923 = vmatmul.msk.bf16.vlgmr.msrb.gmra.mxu3 %vm174_vm1, %v1404_v25 }
 0xa8b   :  { %1741 = vst.msk [vmem:[#allocation11 + $0x4] sm:$0xf] %vm1739_vm8, %v1738_v27 }
 0xa9f   :  { %v1393_v12 = vpop.xlane.xlu1 %1392 }
 0xaa0   :  { %2154 = vrcp.f32 %v1393_v12 }
 0xaa6   :  { %v2155_v21 = vpop.eup %2154 }
 0xaa7   :  { %v1399_v29 = vmul.f32 %v2155_v21, %v2812_v48 }
 0xaa9   :  { %v1401_v30 = vadd.f32 %v1399_v29, %v1285_v28  ;;  %v1403_v33 = vpack.c.bf16 %v1399_v29, %v1399_v29 }
 0xaab   :  { %v1735_v34 = vmul.f32 0.25, %v1401_v30  ;;  %1922 = vmatmul.msk.bf16.vlgmr.msra.gmra.mxu2 %vm174_vm1, %v1403_v33  ;;  %v1994_v33 = vld [vmem:[%s2938_s8 + $0x10] sm:$0xff] }
 0xaad   :  { %v1737_v35 = vpack.c.bf16 %v1735_v34, %v1735_v34 }
 0xaaf   :  { %1740 = vst.msk [vmem:[#allocation11] sm:$0xf] %vm1739_vm8, %v1737_v35  ;;  %vm1792_vm8 = vcmask 253952  }
 0xab0   :  { %1820 = dma.vmem_to_hbm [thread:$0]  %s1813_s30, 128, %s1815_s4, [#allocation12], %s2334_s1, %s2334_s1, %s2343_s15  }
 0xabb   :  { %v1068_v36 = vpop.f32.mrf.mxu2 }
 0xac3   :  { %v1070_v37 = vpop.f32.mrf.mxu2 }
 0xada   :  { %v1089_v38 = vpop.f32.mrf.mxu3 }
 0xae2   :  { %v1091_v39 = vpop.f32.mrf.mxu3  ;;  %v1190_v40 = vpop.f32.mrf.mxu2 }
 0xaea   :  { %v1192_v42 = vpop.f32.mrf.mxu2 }
 0xaeb   :  { %v1211_v43 = vpop.f32.mrf.mxu3 }
 0xaec   :  { %v2041_v44 = vpack.i.bf16 %v1211_v43, %v1190_v40 }
 0xaee   :  { %2042 = vrot.lane.b32.xlu0 %v2041_v44, %s2967_s24 }
 0xaf2   :  { %v1306_v45 = vpop.f32.mrf.mxu2 }
 0xaf3   :  { %v1213_v49 = vpop.f32.mrf.mxu3 }
 0xafa   :  { %v1308_v48 = vpop.f32.mrf.mxu2 }
 0xafc   :  { %v1327_v50 = vpop.f32.mrf.mxu3 }
 0xafd   :  { %v2046_v41 = vpack.i.bf16 %v1327_v50, %v1306_v45 }
 0xaff   :  { %2047 = vrot.lane.b32.xlu2 %v2046_v41, %s2968_s25 }
 0xb04   :  { %v1329_v52 = vpop.f32.mrf.mxu3 }
 0xb05   :  { %v2076_v52 = vld [vmem:[%s2942_s12 + $0x1] ss:$0 sm:$0xff] }
 0xb0c   :  { %v1443_v54 = vpop.f32.mrf.mxu3 }
 0xb14   :  { %v1445_v55 = vpop.f32.mrf.mxu3 }
 0xb2e   :  { %v1422_v2 = vpop.f32.mrf.mxu2 }
 0xb2f   :  { %v2051_v51 = vpack.i.bf16 %v1443_v54, %v1422_v2 }
 0xb31   :  { %2052 = vrot.lane.b32.xlu0 %v2051_v51, %s2969_s27  ;;  %v2077_v51 = vld [vmem:[#allocation7 + $0x1] ss:$0 sm:$0xff] }
 0xb36   :  { %v1424_v56 = vpop.f32.mrf.mxu2 }
 0xb59   :  { %v2048_v46 = vpop.permute.xlu2 %2047 }
 0xb5a   :  { %v2050_v63 = vunpack.i.h.bf16 %v2048_v46  ;;  %v2049_v0 = vunpack.i.l.bf16 %v2048_v46  ;;  %v1999_v46 = vld [vmem:[%s2940_s10 + $0x38] sm:$0xff] }
 0xb5b   :  { %1665 = vmatpush.bf16.msrb.mxu2 %v1999_v46 }
 0xb60   :  { %v2043_v59 = vpop.permute.xlu0 %2042 }
 0xb61   :  { %v2045_v60 = vunpack.i.h.bf16 %v2043_v59  ;;  %v2044_v61 = vunpack.i.l.bf16 %v2043_v59 }
 0xb63   :  { %v1472_v62 = vsel %vm174_vm1, %v1089_v38, %v2045_v60  ;;  %v1471_v47 = vsel %vm174_vm1, %v1068_v36, %v2044_v61 }
 0xb64   :  { %v1473_v5 = vsel %vm667_vm3, %v1471_v47, %v2049_v0  ;;  %v1474_v6 = vsel %vm667_vm3, %v1472_v62, %v2050_v63  ;;  %v1998_v62 = vld [vmem:[%s2940_s10 + $0x30] sm:$0xff]  ;;  %v1997_v47 = vld [vmem:[%s2940_s10 + $0x28] sm:$0xff]  ;;  %v1996_v63 = vld [vmem:[%s2940_s10 + $0x20] sm:$0xff] }
 0xb65   :  { %1666 = vmatpush.bf16.msrb.mxu2 %v1998_v62 }
 0xb69   :  { %1667 = vmatpush.bf16.msrb.mxu2 %v1997_v47 }
 0xb6d   :  { %1668 = vmatpush.bf16.msrb.mxu2 %v1996_v63 }
 0xba3   :  { %v2053_v58 = vpop.permute.xlu0 %2052 }
 0xba4   :  { %v2055_v1 = vunpack.i.h.bf16 %v2053_v58  ;;  %v2054_v4 = vunpack.i.l.bf16 %v2053_v58  ;;  %v2078_v58 = vld [vmem:[%s2939_s9 + $0x1] ss:$0 sm:$0xff] }
 0xba6   :  { %v1476_v7 = vsel %vm670_vm4, %v1474_v6, %v2055_v1  ;;  %v1475_v8 = vsel %vm670_vm4, %v1473_v5, %v2054_v4 }
 0xba7   :  { %v1477_v9 = vpack.c.bf16 %v1476_v7, %v1475_v8 }
 0xba9   :  { %1937 = vmatmul.msk.bf16.vlgmr.msrb.gmra.mxu0 %vm145_vm0, %v1477_v9  ;;  %v2079_v9 = vld [vmem:[%s2941_s11 + $0x1] ss:$0 sm:$0xff] }
 0xc26   :  { %v1512_v11 = vpop.f32.mrf.mxu0 }
 0xc27   :  { %v1513_v13 = vadd.f32 %v2075_v10, %v1512_v11 }
 0xc29   :  { %v1517_v14 = vadd.f32 %v1513_v13, %v2685_v31 }
 0xc2b   :  { %v1519_v15 = vsel %vm145_vm0, %v1517_v14, 0.0 }
 0xc2c   :  { %1520 = vadd.xlane.f32.xlu2 %v1519_v15 }
 0xc2e   :  { %v1514_v16 = vpop.f32.mrf.mxu0 }
 0xc2f   :  { %v1515_v17 = vadd.f32 %v2075_v10, %v1514_v16 }
 0xc31   :  { %v1518_v18 = vadd.f32 %v1515_v17, %v2687_v32  ;;  %v1995_v32 = vld [vmem:[%s2938_s8 + $0x18] sm:$0xff] }
 0xc32   :  { %1609 = vmatpush.bf16.msrb.mxu1 %v1995_v32 }
 0xc33   :  { %v1522_v19 = vsel %vm145_vm0, %v1518_v18, 0.0 }
 0xc34   :  { %1523 = vadd.xlane.f32.xlu0 %v1522_v19  ;;  %v1746_v19 = vld [vmem:[%s2933_s3] sm:$0x1] }
 0xc36   :  { %1610 = vmatpush.bf16.msrb.mxu1 %v1994_v33 }
 0xc9f   :  { %v1521_v20 = vpop.xlane.xlu2 %1520 }
 0xca0   :  { %v1525_v22 = vmul.f32 %v1521_v20, %v2631_v53  ;;  %v1749_v20 = vlaneseq }
 0xca2   :  { %v1527_v23 = vsub.f32 %v1517_v14, %v1525_v22  ;;  %v2340_v22 = vmov 0  }
 0xca3   :  { %2062 = vset.pattern.permute.xlu0 %v2340_v22  ;;  %2063 = vset.pattern.permute.xlu1 %v2340_v22 }
 0xca4   :  { %v1529_v24 = vmul.f32 %v1527_v23, %v1527_v23  ;;  %1780 = vperm.xlu0 %2062, %v1746_v19  }
 0xca6   :  { %v1531_v25 = vsel %vm145_vm0, %v1529_v24, 0.0 }
 0xca7   :  { %v1524_v26 = vpop.xlane.xlu0 %1523  ;;  %1532 = vadd.xlane.f32.xlu1 %v1531_v25 }
 0xca8   :  { %v1526_v31 = vmul.f32 %v1524_v26, %v2631_v53 }
 0xcaa   :  { %v1528_v27 = vsub.f32 %v1518_v18, %v1526_v31 }
 0xcac   :  { %v1530_v12 = vmul.f32 %v1528_v27, %v1528_v27 }
 0xcae   :  { %v1534_v21 = vsel %vm145_vm0, %v1530_v12, 0.0  ;;  %v122_v12 = vld [vmem:[%s2963_s13 + $0x1] sm:$0x1] }
 0xcaf   :  { %1535 = vadd.xlane.f32.xlu1 %v1534_v21 }
 0xd1a   :  { %v1533_v28 = vpop.xlane.xlu1 %1532 }
 0xd1b   :  { %v1537_v29 = vmul.f32 %v1533_v28, %v2631_v53 }
 0xd1d   :  { %v1539_v30 = vadd.f32 1e-05, %v1537_v29  ;;  %v2341_v29 = vmov 1.0  }
 0xd1f   :  { %2156 = vrsqrt.f32 %v1539_v30  ;;  %vm1547_vm2 = vweird.f32 %v1539_v30 }
 0xd22   :  { %v1536_v34 = vpop.xlane.xlu1 %1535 }
 0xd23   :  { %v1538_v35 = vmul.f32 %v1536_v34, %v2631_v53 }
 0xd25   :  { %v2157_v36 = vpop.eup %2156  ;;  %v1540_v37 = vadd.f32 1e-05, %v1538_v35 }
 0xd26   :  { %v1542_v38 = vmul.f32 %v2157_v36, %v1539_v30  ;;  %vm1548_vm1 = vweird.f32 %v2157_v36 }
 0xd27   :  { %2158 = vrsqrt.f32 %v1540_v37  ;;  %vm1549_vm3 = vmor %vm1547_vm2, %vm1548_vm1  ;;  %vm1557_vm9 = vweird.f32 %v1540_v37 }
 0xd28   :  { %v1543_v39 = vmul.f32 %v2157_v36, %v1542_v38 }
 0xd2a   :  { %v1544_v40 = vmul.f32 0.5, %v1543_v39 }
 0xd2c   :  { %v1545_v42 = vsub.f32 1.5, %v1544_v40  ;;  %v1747_v40 = vld [vmem:[%s2933_s3 + $0x1] sm:$0x1] }
 0xd2d   :  { %v2159_v43 = vpop.eup %2158 }
 0xd2e   :  { %v1546_v44 = vmul.f32 %v2157_v36, %v1545_v42  ;;  %v1552_v45 = vmul.f32 %v2159_v43, %v1540_v37  ;;  %vm1558_vm4 = vweird.f32 %v2159_v43 }
 0xd2f   :  { %vm1559_vm10 = vmor %vm1557_vm9, %vm1558_vm4 }
 0xd30   :  { %v1553_v49 = vmul.f32 %v2159_v43, %v1552_v45  ;;  %v1550_v48 = vsel %vm1549_vm3, %v2157_v36, %v1546_v44 }
 0xd31   :  { %v1561_v54 = vmul.f32 %v1550_v48, %v1527_v23  ;;  %v1750_v23 = vshrl.u32 %v1749_v20, 7 }
 0xd32   :  { %v1554_v50 = vmul.f32 0.5, %v1553_v49 }
 0xd33   :  { %v1568_v56 = vmul.f32 %v2076_v52, %v1561_v54  ;;  %2056 = vset.pattern.permute.xlu2 %v1750_v23 }
 0xd34   :  { %v1555_v41 = vsub.f32 1.5, %v1554_v50 }
 0xd35   :  { %v1575_v59 = vadd.f32 %v2077_v51, %v1568_v56 }
 0xd36   :  { %v1556_v55 = vmul.f32 %v2159_v43, %v1555_v41 }
 0xd38   :  { %v1560_v2 = vsel %vm1559_vm10, %v2159_v43, %v1556_v55 }
 0xd39   :  { %v1562_v3 = vmul.f32 %v1560_v2, %v1528_v27  ;;  %v121_v27 = vld [vmem:[%s2963_s13] sm:$0x1] }
 0xd3a   :  { %vm1742_vm11 = vcmp.lt.f32.partialorder %v121_v27, -0.5 }
 0xd3b   :  { %v1569_v57 = vmul.f32 %v2076_v52, %v1562_v3  ;;  %v1744_v30 = vsel %vm1742_vm11, 0.0, %v2341_v29  ;;  %v2080_v3 = vld [vmem:[%s2944_s14 + $0x1] ss:$0 sm:$0xff]  ;;  %s2344_s14 = smov [#allocation10]  }
 0xd3c   :  { %v1748_v35 = vperm.slane %v1744_v30, 0  ;;  %s1799_s1 = sshll.u32 %s2344_s14, 4  ;;  %s1800_s1 = int_to_ptr.vmem [resolvable:$true] %s1799_s1 }
 0xd3d   :  { %v1576_v60 = vadd.f32 %v2077_v51, %v1569_v57 }
 0xd3f   :  { %v1577_v61 = vpack.c.bf16 %v1576_v60, %v1575_v59 }
 0xd41   :  { %1952 = vmatmul.msk.bf16.vlgmr.msrb.gmra.mxu1 %vm145_vm0, %v1577_v61 }
 0xdbe   :  { %v1612_v0 = vpop.f32.mrf.mxu1 }
 0xdbf   :  { %v1613_v1 = vadd.f32 %v2078_v58, %v1612_v0 }
 0xdc1   :  { %v1617_v6 = vmax.f32 %v1613_v1, 0.0 }
 0xdc6   :  { %v1614_v4 = vpop.f32.mrf.mxu1 }
 0xdc7   :  { %v1615_v5 = vadd.f32 %v2078_v58, %v1614_v4 }
 0xdc9   :  { %v1618_v7 = vmax.f32 %v1615_v5, 0.0 }
 0xdcb   :  { %v1619_v8 = vpack.c.bf16 %v1618_v7, %v1617_v6 }
 0xdcd   :  { %1978 = vmatmul.msk.bf16.vlgmr.msrb.gmra.mxu2 %vm853_vm12, %v1619_v8  ;;  %vm1743_vm12 = vcmp.lt.f32.partialorder %v122_v12, -0.5 }
 0xdce   :  { %v1745_v33 = vsel %vm1743_vm12, 0.0, %v2341_v29 }
 0xdcf   :  { %v1755_v36 = vperm.slane %v1745_v33, 0 }
 0xdd1   :  { %v2057_v38 = vpack.i.bf16 %v1755_v36, %v1748_v35 }
 0xdd3   :  { %2058 = vperm.xlu2 %2056, %v2057_v38  }
 0xe50   :  { %v1670_v10 = vpop.f32.mrf.mxu2 }
 0xe51   :  { %v1671_v11 = vadd.f32 %v2079_v9, %v1670_v10 }
 0xe53   :  { %v1675_v13 = vadd.f32 %v1671_v11, %v1575_v59 }
 0xe55   :  { %v1677_v14 = vsel %vm145_vm0, %v1675_v13, 0.0 }
 0xe56   :  { %1678 = vadd.xlane.f32.xlu1 %v1677_v14 }
 0xe58   :  { %v1672_v15 = vpop.f32.mrf.mxu2 }
 0xe59   :  { %v1673_v16 = vadd.f32 %v2079_v9, %v1672_v15  ;;  %v1781_v15 = vpop.permute.xlu0 %1780 }
 0xe5a   :  { %v1783_v20 = vperm.slane %v1781_v15, 0 }
 0xe5b   :  { %v1676_v17 = vadd.f32 %v1673_v16, %v1576_v60  ;;  %v2081_v60 = vld [vmem:[#allocation8 + $0x1] ss:$0 sm:$0xff] }
 0xe5d   :  { %v1680_v18 = vsel %vm145_vm0, %v1676_v17, 0.0 }
 0xe5e   :  { %1681 = vadd.xlane.f32.xlu1 %v1680_v18 }
 0xec9   :  { %v1679_v24 = vpop.xlane.xlu1 %1678 }
 0xeca   :  { %v1683_v25 = vmul.f32 %v1679_v24, %v2631_v53 }
 0xecc   :  { %v1685_v26 = vsub.f32 %v1675_v13, %v1683_v25 }
 0xece   :  { %v1687_v31 = vmul.f32 %v1685_v26, %v1685_v26 }
 0xed0   :  { %v1689_v21 = vsel %vm145_vm0, %v1687_v31, 0.0 }
 0xed1   :  { %1690 = vadd.xlane.f32.xlu1 %v1689_v21  ;;  %v1682_v32 = vpop.xlane.xlu1 %1681 }
 0xed2   :  { %v1684_v28 = vmul.f32 %v1682_v32, %v2631_v53 }
 0xed4   :  { %v1686_v34 = vsub.f32 %v1676_v17, %v1684_v28 }
 0xed6   :  { %v1688_v37 = vmul.f32 %v1686_v34, %v1686_v34 }
 0xed8   :  { %v1692_v39 = vsel %vm145_vm0, %v1688_v37, 0.0 }
 0xed9   :  { %1693 = vadd.xlane.f32.xlu1 %v1692_v39 }
 0xef2   :  { %1786 = vperm.xlu1 %2063, %v1747_v40  }
 0xf44   :  { %v1691_v42 = vpop.xlane.xlu1 %1690 }
 0xf45   :  { %v1695_v43 = vmul.f32 %v1691_v42, %v2631_v53 }
 0xf47   :  { %v1697_v44 = vadd.f32 1e-05, %v1695_v43 }
 0xf49   :  { %2160 = vrsqrt.f32 %v1697_v44  ;;  %vm1705_vm14 = vweird.f32 %v1697_v44 }
 0xf4c   :  { %v1694_v45 = vpop.xlane.xlu1 %1693 }
 0xf4d   :  { %v1696_v49 = vmul.f32 %v1694_v45, %v2631_v53  ;;  %v2059_v53 = vpop.permute.xlu2 %2058 }
 0xf4e   :  { %v2060_v62 = vunpack.i.l.bf16 %v2059_v53  ;;  %v2061_v8 = vunpack.i.h.bf16 %v2059_v53 }
 0xf4f   :  { %v2161_v48 = vpop.eup %2160  ;;  %v1698_v50 = vadd.f32 1e-05, %v1696_v49 }
 0xf50   :  { %v1700_v41 = vmul.f32 %v2161_v48, %v1697_v44  ;;  %vm1706_vm13 = vweird.f32 %v2161_v48 }
 0xf51   :  { %2162 = vrsqrt.f32 %v1698_v50  ;;  %vm1707_vm15 = vmor %vm1705_vm14, %vm1706_vm13  ;;  %vm1715_vm6 = vweird.f32 %v1698_v50 }
 0xf52   :  { %v1701_v52 = vmul.f32 %v2161_v48, %v1700_v41 }
 0xf54   :  { %v1702_v54 = vmul.f32 0.5, %v1701_v52 }
 0xf56   :  { %v1703_v55 = vsub.f32 1.5, %v1702_v54 }
 0xf57   :  { %v2163_v2 = vpop.eup %2162 }
 0xf58   :  { %v1704_v51 = vmul.f32 %v2161_v48, %v1703_v55  ;;  %v1710_v56 = vmul.f32 %v2163_v2, %v1698_v50  ;;  %vm1716_vm5 = vweird.f32 %v2163_v2 }
 0xf59   :  { %vm1717_vm7 = vmor %vm1715_vm6, %vm1716_vm5 }
 0xf5a   :  { %v1708_v57 = vsel %vm1707_vm15, %v2161_v48, %v1704_v51  ;;  %v1711_v59 = vmul.f32 %v2163_v2, %v1710_v56 }
 0xf5b   :  { %v1719_v61 = vmul.f32 %v1708_v57, %v1685_v26 }
 0xf5c   :  { %v1712_v46 = vmul.f32 0.5, %v1711_v59 }
 0xf5d   :  { %v1726_v47 = vmul.f32 %v2080_v3, %v1719_v61 }
 0xf5e   :  { %v1713_v63 = vsub.f32 1.5, %v1712_v46 }
 0xf5f   :  { %v1733_v0 = vadd.f32 %v2081_v60, %v1726_v47 }
 0xf60   :  { %v1714_v58 = vmul.f32 %v2163_v2, %v1713_v63 }
 0xf61   :  { %v1762_v1 = vmul.f32 %v2060_v62, %v1733_v0 }
 0xf62   :  { %v1718_v4 = vsel %vm1717_vm7, %v2163_v2, %v1714_v58 }
 0xf63   :  { %v1720_v5 = vmul.f32 %v1718_v4, %v1686_v34  ;;  %v1764_v6 = vsel %vm145_vm0, %v1762_v1, 0.0 }
 0xf64   :  { %v1765_v7 = vrot.slane %v1764_v6, 4  ;;  %v1787_v26 = vpop.permute.xlu1 %1786 }
 0xf65   :  { %v1727_v9 = vmul.f32 %v2080_v3, %v1720_v5  ;;  %v1789_v12 = vperm.slane %v1787_v26, 0 }
 0xf66   :  { %v1766_v10 = vadd.f32 %v1765_v7, %v1764_v6 }
 0xf67   :  { %v1734_v11 = vadd.f32 %v2081_v60, %v1727_v9 }
 0xf68   :  { %v1767_v13 = vrot.slane %v1766_v10, 2 }
 0xf69   :  { %v1763_v14 = vmul.f32 %v2061_v8, %v1734_v11 }
 0xf6a   :  { %v1768_v16 = vadd.f32 %v1767_v13, %v1766_v10 }
 0xf6b   :  { %v1771_v17 = vsel %vm145_vm0, %v1763_v14, 0.0 }
 0xf6c   :  { %v1772_v18 = vrot.slane %v1771_v17, 4  ;;  %v1769_v19 = vrot.slane %v1768_v16, 1 }
 0xf6e   :  { %v1773_v22 = vadd.f32 %v1772_v18, %v1771_v17  ;;  %v1770_v23 = vadd.f32 %v1769_v19, %v1768_v16 }
 0xf70   :  { %v1774_v24 = vrot.slane %v1773_v22, 2  ;;  %v1790_v25 = vmul.f32 %v1783_v20, %v1770_v23 }
 0xf72   :  { %v1775_v31 = vadd.f32 %v1774_v24, %v1773_v22  ;;  %1793 = vst.msk [vmem:[#allocation10] sm:$0x1] %vm1792_vm8, %v1790_v25 }
 0xf74   :  { %v1776_v27 = vrot.slane %v1775_v31, 1 }
 0xf76   :  { %v1777_v21 = vadd.f32 %v1776_v27, %v1775_v31 }
 0xf78   :  { %v1791_v32 = vmul.f32 %v1789_v12, %v1777_v21 }
 0xf7a   :  { %1794 = vst.msk [vmem:[#allocation10 + $0x1] sm:$0x1] %vm1792_vm8, %v1791_v32 }
 0xf7b   :  { %1807 = dma.vmem_to_hbm [thread:$0]  %s1800_s1, 32, %s1802_s21, [#allocation4], %s2968_s25, %s2968_s25, %s2970_s5  }
 0xf7c   :  { %2315 = dma.done.wait [#allocation4], 32  }
 0xf7d   :  { %2316 = vsyncadd [#allocation4], 4294967264 }
 0xf7e   :  { %2317 = dma.done.wait [#allocation12], 128  }
 0xf7f   :  { %2318 = vsyncadd [#allocation12], 4294967168 }
 0xf80   :  { %1829 = vsyncpa [#allocation3], 1 }
 0xf81   :  { %1830 = vsyncpa [#allocation6], 1 }
 0xf82   :  { %1831 = vsyncpa [#allocation9], 1 }
 0xf83   :  { %1832 = vsyncpa [#allocation4], 1 }
 0xf84   :  { %1833 = vsyncpa [#allocation12], 1 }

</bundles_post_ra>
